<compile_context>
chip_gen: v7x
topology: tpu7x:2x2x1
jax: 0.10.0
libtpu: 0.0.40
codegen_flags: <defaults>
</compile_context>

<pallas_src>
import functools
import math

import jax
import jax.numpy as jnp
from jax.experimental import pallas as pl
from jax.experimental.pallas import tpu as pltpu

CONFIG = dict(
    vocab_size=100,
    segment_vocab=3,
    hidden=32,
    num_heads=4,
    ff_hidden=64,
    num_layers=2,
    max_seq=8,
)
LN_EPS = 1e-12


def _layernorm(x, g, b, eps=LN_EPS):
    mu = jnp.mean(x, axis=-1, keepdims=True)
    var = jnp.mean((x - mu) ** 2, axis=-1, keepdims=True)
    return (x - mu) * jax.lax.rsqrt(var + eps) * g + b


# ------------------------------------------------------------ fused encoder kernel
def encoder_kernel(emb_ref, mask_ref, embln_ref,
                   wqkv_ref, bqkv_ref, wo_ref, w1_ref, b1_ref, w2_ref, misc_ref,
                   o_ref, *, num_heads):
    """One grid point = one batch element; the full L-layer stack runs inside.

    Stacked-weight refs are indexed with a *static* layer index (Python loop),
    so every weight slice is a cheap VMEM read.  misc rows per layer:
    [ln1_g, ln1_b, ln2_g, ln2_b, bo, b2].
    """
    seq, hidden = emb_ref.shape
    num_layers = wqkv_ref.shape[0]
    dh = hidden // num_heads
    scale = 1.0 / math.sqrt(dh)

    # Embedding LayerNorm (folded into the kernel; no extra grid step).
    x = _layernorm(emb_ref[...], embln_ref[0:1, :], embln_ref[1:2, :])  # (S, H)

    # Additive key mask, broadcast once for all layers/heads (hoisted).
    neg = jnp.broadcast_to(mask_ref[...].reshape(1, 1, seq),
                           (num_heads, seq, seq))                        # (h, S, S)

    for l in range(num_layers):                 # static unroll (L = 2)
        m = misc_ref[l]                         # (6, H)

        # ---- multi-head self-attention: one packed QKV MXU push ----
        qkv = (jnp.dot(x, wqkv_ref[l], preferred_element_type=jnp.float32)
               + bqkv_ref[l])                   # (S, 3H)
        q = qkv[:, 0 * hidden:1 * hidden]
        k = qkv[:, 1 * hidden:2 * hidden]
        v = qkv[:, 2 * hidden:3 * hidden]

        # Head-major (num_heads, S, dh) views: leading-dim stack (cheap) so the
        # attention matmuls are a SINGLE batched dot_general over the head axis.
        q3 = jnp.stack([q[:, h * dh:(h + 1) * dh] for h in range(num_heads)], axis=0)
        k3 = jnp.stack([k[:, h * dh:(h + 1) * dh] for h in range(num_heads)], axis=0)
        v3 = jnp.stack([v[:, h * dh:(h + 1) * dh] for h in range(num_heads)], axis=0)

        s = jnp.einsum('hqd,hkd->hqk', q3, k3,
                       preferred_element_type=jnp.float32) * scale + neg  # (h, S, S)
        s = s - jnp.max(s, axis=-1, keepdims=True)
        p = jnp.exp(s)
        p = p / jnp.sum(p, axis=-1, keepdims=True)      # exact softmax denom
        ctx3 = jnp.einsum('hqk,hkd->hqd', p, v3,
                          preferred_element_type=jnp.float32)             # (h, S, dh)
        ctx = jnp.concatenate([ctx3[h] for h in range(num_heads)], axis=-1)  # (S, H)

        attn = (jnp.dot(ctx, wo_ref[l], preferred_element_type=jnp.float32)
                + m[4:5, :])
        h1 = _layernorm(x + attn, m[0:1, :], m[1:2, :])

        # ---- feed-forward ----
        f = jnp.dot(h1, w1_ref[l], preferred_element_type=jnp.float32) + b1_ref[l]
        f = jax.nn.gelu(f, approximate=True)
        f = jnp.dot(f, w2_ref[l], preferred_element_type=jnp.float32) + m[5:6, :]

        x = _layernorm(h1 + f, m[2:3, :], m[3:4, :])    # carried in vregs

    o_ref[...] = x                                      # single store per batch elem


# ------------------------------------------------------------------ params / forward
def init_params(key, cfg):
    H, FF, L = cfg['hidden'], cfg['ff_hidden'], cfg['num_layers']
    V, SEGV, MS = cfg['vocab_size'], cfg['segment_vocab'], cfg['max_seq']

    def normal(k, shape):
        return (0.02 * jax.random.normal(k, shape)).astype(jnp.float32)

    k = jax.random.split(key, 7)
    # misc rows: ln1_g=1, ln1_b=0, ln2_g=1, ln2_b=0, bo=0, b2=0
    misc_template = jnp.array([1., 0., 1., 0., 0., 0.], jnp.float32)
    return dict(
        tok_emb=normal(k[0], (V, H)),
        seg_emb=normal(k[1], (SEGV, H)),
        pos_emb=normal(k[2], (MS, H)),
        emb_ln=jnp.concatenate([jnp.ones((1, H), jnp.float32),
                                jnp.zeros((1, H), jnp.float32)], axis=0),
        w_qkv=normal(k[3], (L, H, 3 * H)),
        b_qkv=jnp.zeros((L, 1, 3 * H), jnp.float32),
        wo=normal(k[4], (L, H, H)),
        w1=normal(k[5], (L, H, FF)),
        b1=jnp.zeros((L, 1, FF), jnp.float32),
        w2=normal(k[6], (L, FF, H)),
        misc=jnp.tile(misc_template[None, :, None], (L, 1, H)),
    )


def bert_encoder(params, x_ids, segment_label, attention_mask, cfg):
    B, S = x_ids.shape
    H, FF, L = cfg['hidden'], cfg['ff_hidden'], cfg['num_layers']

    # Embedding lookup (gather) is plain-JAX glue; everything else is one kernel.
    emb = (params['tok_emb'][x_ids]
           + params['seg_emb'][segment_label]
           + params['pos_emb'][None, :S, :]).astype(jnp.float32)            # (B, S, H)
    neg_mask = ((1.0 - attention_mask.astype(jnp.float32)) * (-1e9))[:, None, :]  # (B,1,S)

    kernel = functools.partial(encoder_kernel, num_heads=cfg['num_heads'])
    per_batch = lambda b: (b, 0, 0)     # one batch element per grid step
    whole = lambda b: (0, 0, 0)         # whole stacked-weight array, resident in VMEM

    return pl.pallas_call(
        kernel,
        out_shape=jax.ShapeDtypeStruct((B, S, H), jnp.float32),
        grid=(B,),
        in_specs=[
            pl.BlockSpec((None, S, H), per_batch),        # embeddings
            pl.BlockSpec((None, 1, S), per_batch),        # additive key mask
            pl.BlockSpec((2, H), lambda b: (0, 0)),       # emb LN gamma/beta
            pl.BlockSpec((L, H, 3 * H), whole),           # packed QKV weight
            pl.BlockSpec((L, 1, 3 * H), whole),           # packed QKV bias
            pl.BlockSpec((L, H, H), whole),               # wo
            pl.BlockSpec((L, H, FF), whole),              # w1
            pl.BlockSpec((L, 1, FF), whole),              # b1
            pl.BlockSpec((L, FF, H), whole),              # w2
            pl.BlockSpec((L, 6, H), whole),               # [ln1_g,ln1_b,ln2_g,ln2_b,bo,b2]
        ],
        out_specs=pl.BlockSpec((None, S, H), per_batch),
        compiler_params=pltpu.CompilerParams(
            dimension_semantics=("parallel",)),           # v7x: one batch elem per TC
    )(emb, neg_mask, params['emb_ln'],
      params['w_qkv'], params['b_qkv'], params['wo'],
      params['w1'], params['b1'], params['w2'], params['misc'])


if __name__ == "__main__":
    cfg = CONFIG
    key = jax.random.PRNGKey(0)
    kp, kx, ks = jax.random.split(key, 3)

    params = init_params(kp, cfg)

    B, S = 2, cfg['max_seq']
    x_ids = jax.random.randint(kx, (B, S), 1, cfg['vocab_size'], dtype=jnp.int32)
    segment_label = jax.random.randint(ks, (B, S), 0, 2, dtype=jnp.int32)
    attention_mask = jnp.ones((B, S), dtype=jnp.int32).at[1, 6:].set(0)

    out = bert_encoder(params, x_ids, segment_label, attention_mask, cfg)
    jax.block_until_ready(out)
    assert out.shape == (B, S, cfg['hidden']) and out.dtype == jnp.float32
    assert bool(jnp.all(jnp.isfinite(out)))
    print("KERNEL_OK")
</pallas_src>

<mosaic_0001>
module attributes {stable_mosaic.version = 11 : i64} {
  func.func @encoder_kernel(%arg0: i32, %arg1: memref<1x8x32xf32, #tpu.memory_space<vmem>>, %arg2: memref<1x1x8xf32, #tpu.memory_space<vmem>>, %arg3: memref<2x32xf32, #tpu.memory_space<vmem>>, %arg4: memref<2x32x96xf32, #tpu.memory_space<vmem>>, %arg5: memref<2x1x96xf32, #tpu.memory_space<vmem>>, %arg6: memref<2x32x32xf32, #tpu.memory_space<vmem>>, %arg7: memref<2x32x64xf32, #tpu.memory_space<vmem>>, %arg8: memref<2x1x64xf32, #tpu.memory_space<vmem>>, %arg9: memref<2x64x32xf32, #tpu.memory_space<vmem>>, %arg10: memref<2x6x32xf32, #tpu.memory_space<vmem>>, %arg11: memref<1x8x32xf32, #tpu.memory_space<vmem>>) attributes {dimension_semantics = [#tpu.dimension_semantics<parallel>], iteration_bounds = array<i64: 2>, scalar_prefetch = 0 : i64, scratch_operands = 0 : i64, tpu.core_type = #tpu.core_type<tc>, window_params = [{transform_indices = @transform_0, window_bounds = array<i64: 1, 8, 32>}, {transform_indices = @transform_1, window_bounds = array<i64: 1, 1, 8>}, {pipeline_mode = #tpu.pipeline_mode<synchronous>, transform_indices = @transform_2, window_bounds = array<i64: 2, 32>}, {pipeline_mode = #tpu.pipeline_mode<synchronous>, transform_indices = @transform_3, window_bounds = array<i64: 2, 32, 96>}, {pipeline_mode = #tpu.pipeline_mode<synchronous>, transform_indices = @transform_4, window_bounds = array<i64: 2, 1, 96>}, {pipeline_mode = #tpu.pipeline_mode<synchronous>, transform_indices = @transform_5, window_bounds = array<i64: 2, 32, 32>}, {pipeline_mode = #tpu.pipeline_mode<synchronous>, transform_indices = @transform_6, window_bounds = array<i64: 2, 32, 64>}, {pipeline_mode = #tpu.pipeline_mode<synchronous>, transform_indices = @transform_7, window_bounds = array<i64: 2, 1, 64>}, {pipeline_mode = #tpu.pipeline_mode<synchronous>, transform_indices = @transform_8, window_bounds = array<i64: 2, 64, 32>}, {pipeline_mode = #tpu.pipeline_mode<synchronous>, transform_indices = @transform_9, window_bounds = array<i64: 2, 6, 32>}, {transform_indices = @transform_10, window_bounds = array<i64: 1, 8, 32>}]} {
    %c0 = arith.constant 0 : index
    %c0_0 = arith.constant 0 : index
    %c0_1 = arith.constant 0 : index
    %0 = vector.load %arg1[%c0, %c0_0, %c0_1] : memref<1x8x32xf32, #tpu.memory_space<vmem>>, vector<1x8x32xf32>
    %1 = vector.shape_cast %0 : vector<1x8x32xf32> to vector<8x32xf32>
    %c0_2 = arith.constant 0 : index
    %c0_3 = arith.constant 0 : index
    %2 = vector.load %arg3[%c0_2, %c0_3] : memref<2x32xf32, #tpu.memory_space<vmem>>, vector<1x32xf32>
    %c1 = arith.constant 1 : index
    %c0_4 = arith.constant 0 : index
    %3 = vector.load %arg3[%c1, %c0_4] : memref<2x32xf32, #tpu.memory_space<vmem>>, vector<1x32xf32>
    %cst = arith.constant dense<0.000000e+00> : vector<8xf32>
    %4 = vector.multi_reduction <add>, %1, %cst [1] : vector<8x32xf32> to vector<8xf32>
    %5 = vector.shape_cast %4 : vector<8xf32> to vector<8x1xf32>
    %cst_5 = arith.constant 3.200000e+01 : f32
    %6 = vector.broadcast %cst_5 : f32 to vector<8x1xf32>
    %7 = arith.divf %5, %6 : vector<8x1xf32>
    %8 = vector.broadcast %7 : vector<8x1xf32> to vector<8x32xf32>
    %9 = arith.subf %1, %8 : vector<8x32xf32>
    %10 = arith.mulf %9, %9 : vector<8x32xf32>
    %cst_6 = arith.constant dense<0.000000e+00> : vector<8xf32>
    %11 = vector.multi_reduction <add>, %10, %cst_6 [1] : vector<8x32xf32> to vector<8xf32>
    %12 = vector.shape_cast %11 : vector<8xf32> to vector<8x1xf32>
    %cst_7 = arith.constant 3.200000e+01 : f32
    %13 = vector.broadcast %cst_7 : f32 to vector<8x1xf32>
    %14 = arith.divf %12, %13 : vector<8x1xf32>
    %15 = vector.broadcast %7 : vector<8x1xf32> to vector<8x32xf32>
    %16 = arith.subf %1, %15 : vector<8x32xf32>
    %cst_8 = arith.constant 9.99999996E-13 : f32
    %17 = vector.broadcast %cst_8 : f32 to vector<8x1xf32>
    %18 = arith.addf %14, %17 : vector<8x1xf32>
    %19 = math.rsqrt %18 : vector<8x1xf32>
    %20 = vector.broadcast %19 : vector<8x1xf32> to vector<8x32xf32>
    %21 = arith.mulf %16, %20 : vector<8x32xf32>
    %22 = vector.broadcast %2 : vector<1x32xf32> to vector<8x32xf32>
    %23 = arith.mulf %21, %22 : vector<8x32xf32>
    %24 = vector.broadcast %3 : vector<1x32xf32> to vector<8x32xf32>
    %25 = arith.addf %23, %24 : vector<8x32xf32>
    %c0_9 = arith.constant 0 : index
    %c0_10 = arith.constant 0 : index
    %c0_11 = arith.constant 0 : index
    %26 = vector.load %arg2[%c0_9, %c0_10, %c0_11] : memref<1x1x8xf32, #tpu.memory_space<vmem>>, vector<1x1x8xf32>
    %27 = vector.shape_cast %26 : vector<1x1x8xf32> to vector<1x8xf32>
    %28 = vector.shape_cast %27 : vector<1x8xf32> to vector<1x1x8xf32>
    %29 = vector.shape_cast %28 : vector<1x1x8xf32> to vector<1x1x8xf32>
    %30 = vector.broadcast %29 : vector<1x1x8xf32> to vector<4x8x8xf32>
    %c0_12 = arith.constant 0 : index
    %c0_13 = arith.constant 0 : index
    %c0_14 = arith.constant 0 : index
    %31 = vector.load %arg10[%c0_12, %c0_13, %c0_14] : memref<2x6x32xf32, #tpu.memory_space<vmem>>, vector<1x6x32xf32>
    %32 = vector.shape_cast %31 : vector<1x6x32xf32> to vector<6x32xf32>
    %c0_15 = arith.constant 0 : index
    %c0_16 = arith.constant 0 : index
    %c0_17 = arith.constant 0 : index
    %33 = vector.load %arg4[%c0_15, %c0_16, %c0_17] : memref<2x32x96xf32, #tpu.memory_space<vmem>>, vector<1x32x96xf32>
    %34 = vector.shape_cast %33 : vector<1x32x96xf32> to vector<32x96xf32>
    %cst_18 = arith.constant dense<0.000000e+00> : vector<8x96xf32>
    %35 = tpu.matmul %25, %34, %cst_18 {dimension_numbers = #tpu.dot_dimension_numbers<[1], [0], [0], [1], [0, 0, 1, 1], [], []>} : vector<8x32xf32>, vector<32x96xf32>, vector<8x96xf32> -> vector<8x96xf32>
    %c0_19 = arith.constant 0 : index
    %c0_20 = arith.constant 0 : index
    %c0_21 = arith.constant 0 : index
    %36 = vector.load %arg5[%c0_19, %c0_20, %c0_21] : memref<2x1x96xf32, #tpu.memory_space<vmem>>, vector<1x1x96xf32>
    %37 = vector.shape_cast %36 : vector<1x1x96xf32> to vector<1x96xf32>
    %38 = vector.broadcast %37 : vector<1x96xf32> to vector<8x96xf32>
    %39 = arith.addf %35, %38 : vector<8x96xf32>
    %40 = vector.extract_strided_slice %39 {offsets = [0, 0], sizes = [8, 32], strides = [1, 1]} : vector<8x96xf32> to vector<8x32xf32>
    %41 = vector.extract_strided_slice %39 {offsets = [0, 32], sizes = [8, 32], strides = [1, 1]} : vector<8x96xf32> to vector<8x32xf32>
    %42 = vector.extract_strided_slice %39 {offsets = [0, 64], sizes = [8, 32], strides = [1, 1]} : vector<8x96xf32> to vector<8x32xf32>
    %43 = vector.extract_strided_slice %40 {offsets = [0, 0], sizes = [8, 8], strides = [1, 1]} : vector<8x32xf32> to vector<8x8xf32>
    %44 = vector.extract_strided_slice %40 {offsets = [0, 8], sizes = [8, 8], strides = [1, 1]} : vector<8x32xf32> to vector<8x8xf32>
    %45 = vector.extract_strided_slice %40 {offsets = [0, 16], sizes = [8, 8], strides = [1, 1]} : vector<8x32xf32> to vector<8x8xf32>
    %46 = vector.extract_strided_slice %40 {offsets = [0, 24], sizes = [8, 8], strides = [1, 1]} : vector<8x32xf32> to vector<8x8xf32>
    %47 = vector.shape_cast %43 : vector<8x8xf32> to vector<1x8x8xf32>
    %48 = vector.shape_cast %44 : vector<8x8xf32> to vector<1x8x8xf32>
    %49 = vector.shape_cast %45 : vector<8x8xf32> to vector<1x8x8xf32>
    %50 = vector.shape_cast %46 : vector<8x8xf32> to vector<1x8x8xf32>
    %51 = tpu.concatenate %47, %48, %49, %50 in 0 : vector<1x8x8xf32>, vector<1x8x8xf32>, vector<1x8x8xf32>, vector<1x8x8xf32> -> vector<4x8x8xf32>
    %52 = vector.extract_strided_slice %41 {offsets = [0, 0], sizes = [8, 8], strides = [1, 1]} : vector<8x32xf32> to vector<8x8xf32>
    %53 = vector.extract_strided_slice %41 {offsets = [0, 8], sizes = [8, 8], strides = [1, 1]} : vector<8x32xf32> to vector<8x8xf32>
    %54 = vector.extract_strided_slice %41 {offsets = [0, 16], sizes = [8, 8], strides = [1, 1]} : vector<8x32xf32> to vector<8x8xf32>
    %55 = vector.extract_strided_slice %41 {offsets = [0, 24], sizes = [8, 8], strides = [1, 1]} : vector<8x32xf32> to vector<8x8xf32>
    %56 = vector.shape_cast %52 : vector<8x8xf32> to vector<1x8x8xf32>
    %57 = vector.shape_cast %53 : vector<8x8xf32> to vector<1x8x8xf32>
    %58 = vector.shape_cast %54 : vector<8x8xf32> to vector<1x8x8xf32>
    %59 = vector.shape_cast %55 : vector<8x8xf32> to vector<1x8x8xf32>
    %60 = tpu.concatenate %56, %57, %58, %59 in 0 : vector<1x8x8xf32>, vector<1x8x8xf32>, vector<1x8x8xf32>, vector<1x8x8xf32> -> vector<4x8x8xf32>
    %61 = vector.extract_strided_slice %42 {offsets = [0, 0], sizes = [8, 8], strides = [1, 1]} : vector<8x32xf32> to vector<8x8xf32>
    %62 = vector.extract_strided_slice %42 {offsets = [0, 8], sizes = [8, 8], strides = [1, 1]} : vector<8x32xf32> to vector<8x8xf32>
    %63 = vector.extract_strided_slice %42 {offsets = [0, 16], sizes = [8, 8], strides = [1, 1]} : vector<8x32xf32> to vector<8x8xf32>
    %64 = vector.extract_strided_slice %42 {offsets = [0, 24], sizes = [8, 8], strides = [1, 1]} : vector<8x32xf32> to vector<8x8xf32>
    %65 = vector.shape_cast %61 : vector<8x8xf32> to vector<1x8x8xf32>
    %66 = vector.shape_cast %62 : vector<8x8xf32> to vector<1x8x8xf32>
    %67 = vector.shape_cast %63 : vector<8x8xf32> to vector<1x8x8xf32>
    %68 = vector.shape_cast %64 : vector<8x8xf32> to vector<1x8x8xf32>
    %69 = tpu.concatenate %65, %66, %67, %68 in 0 : vector<1x8x8xf32>, vector<1x8x8xf32>, vector<1x8x8xf32>, vector<1x8x8xf32> -> vector<4x8x8xf32>
    "tpu.trace_start"() <{level = 10 : i32, message = "hqd,hkd->hqk"}> : () -> ()
    %cst_22 = arith.constant dense<0.000000e+00> : vector<4x8x8xf32>
    %70 = tpu.matmul %51, %60, %cst_22 {dimension_numbers = #tpu.dot_dimension_numbers<[2], [2], [1], [1], [0, 0, 0, 1, 1, 1], [0], [0]>} : vector<4x8x8xf32>, vector<4x8x8xf32>, vector<4x8x8xf32> -> vector<4x8x8xf32>
    "tpu.trace_stop"() : () -> ()
    %cst_23 = arith.constant 0.353553385 : f32
    %71 = vector.broadcast %cst_23 : f32 to vector<4x8x8xf32>
    %72 = arith.mulf %70, %71 : vector<4x8x8xf32>
    %73 = arith.addf %72, %30 : vector<4x8x8xf32>
    %cst_24 = arith.constant dense<0xFF800000> : vector<4x8xf32>
    %74 = vector.multi_reduction <maximumf>, %73, %cst_24 [2] : vector<4x8x8xf32> to vector<4x8xf32>
    %75 = vector.shape_cast %74 : vector<4x8xf32> to vector<4x8x1xf32>
    %76 = vector.broadcast %75 : vector<4x8x1xf32> to vector<4x8x8xf32>
    %77 = arith.subf %73, %76 : vector<4x8x8xf32>
    %78 = math.exp %77 : vector<4x8x8xf32>
    %cst_25 = arith.constant dense<0.000000e+00> : vector<4x8xf32>
    %79 = vector.multi_reduction <add>, %78, %cst_25 [2] : vector<4x8x8xf32> to vector<4x8xf32>
    %80 = vector.shape_cast %79 : vector<4x8xf32> to vector<4x8x1xf32>
    %81 = vector.broadcast %80 : vector<4x8x1xf32> to vector<4x8x8xf32>
    %82 = arith.divf %78, %81 : vector<4x8x8xf32>
    "tpu.trace_start"() <{level = 10 : i32, message = "hqk,hkd->hqd"}> : () -> ()
    %cst_26 = arith.constant dense<0.000000e+00> : vector<4x8x8xf32>
    %83 = tpu.matmul %82, %69, %cst_26 {dimension_numbers = #tpu.dot_dimension_numbers<[2], [1], [1], [2], [0, 0, 0, 1, 1, 2], [0], [0]>} : vector<4x8x8xf32>, vector<4x8x8xf32>, vector<4x8x8xf32> -> vector<4x8x8xf32>
    "tpu.trace_stop"() : () -> ()
    %84 = vector.extract_strided_slice %83 {offsets = [0, 0, 0], sizes = [1, 8, 8], strides = [1, 1, 1]} : vector<4x8x8xf32> to vector<1x8x8xf32>
    %85 = vector.shape_cast %84 : vector<1x8x8xf32> to vector<8x8xf32>
    %86 = vector.extract_strided_slice %83 {offsets = [1, 0, 0], sizes = [1, 8, 8], strides = [1, 1, 1]} : vector<4x8x8xf32> to vector<1x8x8xf32>
    %87 = vector.shape_cast %86 : vector<1x8x8xf32> to vector<8x8xf32>
    %88 = vector.extract_strided_slice %83 {offsets = [2, 0, 0], sizes = [1, 8, 8], strides = [1, 1, 1]} : vector<4x8x8xf32> to vector<1x8x8xf32>
    %89 = vector.shape_cast %88 : vector<1x8x8xf32> to vector<8x8xf32>
    %90 = vector.extract_strided_slice %83 {offsets = [3, 0, 0], sizes = [1, 8, 8], strides = [1, 1, 1]} : vector<4x8x8xf32> to vector<1x8x8xf32>
    %91 = vector.shape_cast %90 : vector<1x8x8xf32> to vector<8x8xf32>
    %92 = tpu.concatenate %85, %87, %89, %91 in 1 : vector<8x8xf32>, vector<8x8xf32>, vector<8x8xf32>, vector<8x8xf32> -> vector<8x32xf32>
    %c0_27 = arith.constant 0 : index
    %c0_28 = arith.constant 0 : index
    %c0_29 = arith.constant 0 : index
    %93 = vector.load %arg6[%c0_27, %c0_28, %c0_29] : memref<2x32x32xf32, #tpu.memory_space<vmem>>, vector<1x32x32xf32>
    %94 = vector.shape_cast %93 : vector<1x32x32xf32> to vector<32x32xf32>
    %cst_30 = arith.constant dense<0.000000e+00> : vector<8x32xf32>
    %95 = tpu.matmul %92, %94, %cst_30 {dimension_numbers = #tpu.dot_dimension_numbers<[1], [0], [0], [1], [0, 0, 1, 1], [], []>} : vector<8x32xf32>, vector<32x32xf32>, vector<8x32xf32> -> vector<8x32xf32>
    %96 = vector.extract_strided_slice %32 {offsets = [4, 0], sizes = [1, 32], strides = [1, 1]} : vector<6x32xf32> to vector<1x32xf32>
    %97 = vector.broadcast %96 : vector<1x32xf32> to vector<8x32xf32>
    %98 = arith.addf %95, %97 : vector<8x32xf32>
    %99 = arith.addf %25, %98 : vector<8x32xf32>
    %100 = vector.extract_strided_slice %32 {offsets = [0, 0], sizes = [1, 32], strides = [1, 1]} : vector<6x32xf32> to vector<1x32xf32>
    %101 = vector.extract_strided_slice %32 {offsets = [1, 0], sizes = [1, 32], strides = [1, 1]} : vector<6x32xf32> to vector<1x32xf32>
    %cst_31 = arith.constant dense<0.000000e+00> : vector<8xf32>
    %102 = vector.multi_reduction <add>, %99, %cst_31 [1] : vector<8x32xf32> to vector<8xf32>
    %103 = vector.shape_cast %102 : vector<8xf32> to vector<8x1xf32>
    %cst_32 = arith.constant 3.200000e+01 : f32
    %104 = vector.broadcast %cst_32 : f32 to vector<8x1xf32>
    %105 = arith.divf %103, %104 : vector<8x1xf32>
    %106 = vector.broadcast %105 : vector<8x1xf32> to vector<8x32xf32>
    %107 = arith.subf %99, %106 : vector<8x32xf32>
    %108 = arith.mulf %107, %107 : vector<8x32xf32>
    %cst_33 = arith.constant dense<0.000000e+00> : vector<8xf32>
    %109 = vector.multi_reduction <add>, %108, %cst_33 [1] : vector<8x32xf32> to vector<8xf32>
    %110 = vector.shape_cast %109 : vector<8xf32> to vector<8x1xf32>
    %cst_34 = arith.constant 3.200000e+01 : f32
    %111 = vector.broadcast %cst_34 : f32 to vector<8x1xf32>
    %112 = arith.divf %110, %111 : vector<8x1xf32>
    %113 = vector.broadcast %105 : vector<8x1xf32> to vector<8x32xf32>
    %114 = arith.subf %99, %113 : vector<8x32xf32>
    %cst_35 = arith.constant 9.99999996E-13 : f32
    %115 = vector.broadcast %cst_35 : f32 to vector<8x1xf32>
    %116 = arith.addf %112, %115 : vector<8x1xf32>
    %117 = math.rsqrt %116 : vector<8x1xf32>
    %118 = vector.broadcast %117 : vector<8x1xf32> to vector<8x32xf32>
    %119 = arith.mulf %114, %118 : vector<8x32xf32>
    %120 = vector.broadcast %100 : vector<1x32xf32> to vector<8x32xf32>
    %121 = arith.mulf %119, %120 : vector<8x32xf32>
    %122 = vector.broadcast %101 : vector<1x32xf32> to vector<8x32xf32>
    %123 = arith.addf %121, %122 : vector<8x32xf32>
    %c0_36 = arith.constant 0 : index
    %c0_37 = arith.constant 0 : index
    %c0_38 = arith.constant 0 : index
    %124 = vector.load %arg7[%c0_36, %c0_37, %c0_38] : memref<2x32x64xf32, #tpu.memory_space<vmem>>, vector<1x32x64xf32>
    %125 = vector.shape_cast %124 : vector<1x32x64xf32> to vector<32x64xf32>
    %cst_39 = arith.constant dense<0.000000e+00> : vector<8x64xf32>
    %126 = tpu.matmul %123, %125, %cst_39 {dimension_numbers = #tpu.dot_dimension_numbers<[1], [0], [0], [1], [0, 0, 1, 1], [], []>} : vector<8x32xf32>, vector<32x64xf32>, vector<8x64xf32> -> vector<8x64xf32>
    %c0_40 = arith.constant 0 : index
    %c0_41 = arith.constant 0 : index
    %c0_42 = arith.constant 0 : index
    %127 = vector.load %arg8[%c0_40, %c0_41, %c0_42] : memref<2x1x64xf32, #tpu.memory_space<vmem>>, vector<1x1x64xf32>
    %128 = vector.shape_cast %127 : vector<1x1x64xf32> to vector<1x64xf32>
    %129 = vector.broadcast %128 : vector<1x64xf32> to vector<8x64xf32>
    %130 = arith.addf %126, %129 : vector<8x64xf32>
    %131 = arith.mulf %130, %130 : vector<8x64xf32>
    %132 = arith.mulf %130, %131 : vector<8x64xf32>
    %cst_43 = arith.constant 4.471500e-02 : f32
    %133 = vector.broadcast %cst_43 : f32 to vector<8x64xf32>
    %134 = arith.mulf %133, %132 : vector<8x64xf32>
    %135 = arith.addf %130, %134 : vector<8x64xf32>
    %cst_44 = arith.constant 0.797884583 : f32
    %136 = vector.broadcast %cst_44 : f32 to vector<8x64xf32>
    %137 = arith.mulf %136, %135 : vector<8x64xf32>
    %138 = math.tanh %137 : vector<8x64xf32>
    %cst_45 = arith.constant 1.000000e+00 : f32
    %139 = vector.broadcast %cst_45 : f32 to vector<8x64xf32>
    %140 = arith.addf %139, %138 : vector<8x64xf32>
    %cst_46 = arith.constant 5.000000e-01 : f32
    %141 = vector.broadcast %cst_46 : f32 to vector<8x64xf32>
    %142 = arith.mulf %141, %140 : vector<8x64xf32>
    %143 = arith.mulf %130, %142 : vector<8x64xf32>
    %c0_47 = arith.constant 0 : index
    %c0_48 = arith.constant 0 : index
    %c0_49 = arith.constant 0 : index
    %144 = vector.load %arg9[%c0_47, %c0_48, %c0_49] : memref<2x64x32xf32, #tpu.memory_space<vmem>>, vector<1x64x32xf32>
    %145 = vector.shape_cast %144 : vector<1x64x32xf32> to vector<64x32xf32>
    %cst_50 = arith.constant dense<0.000000e+00> : vector<8x32xf32>
    %146 = tpu.matmul %143, %145, %cst_50 {dimension_numbers = #tpu.dot_dimension_numbers<[1], [0], [0], [1], [0, 0, 1, 1], [], []>} : vector<8x64xf32>, vector<64x32xf32>, vector<8x32xf32> -> vector<8x32xf32>
    %147 = vector.extract_strided_slice %32 {offsets = [5, 0], sizes = [1, 32], strides = [1, 1]} : vector<6x32xf32> to vector<1x32xf32>
    %148 = vector.broadcast %147 : vector<1x32xf32> to vector<8x32xf32>
    %149 = arith.addf %146, %148 : vector<8x32xf32>
    %150 = arith.addf %123, %149 : vector<8x32xf32>
    %151 = vector.extract_strided_slice %32 {offsets = [2, 0], sizes = [1, 32], strides = [1, 1]} : vector<6x32xf32> to vector<1x32xf32>
    %152 = vector.extract_strided_slice %32 {offsets = [3, 0], sizes = [1, 32], strides = [1, 1]} : vector<6x32xf32> to vector<1x32xf32>
    %cst_51 = arith.constant dense<0.000000e+00> : vector<8xf32>
    %153 = vector.multi_reduction <add>, %150, %cst_51 [1] : vector<8x32xf32> to vector<8xf32>
    %154 = vector.shape_cast %153 : vector<8xf32> to vector<8x1xf32>
    %cst_52 = arith.constant 3.200000e+01 : f32
    %155 = vector.broadcast %cst_52 : f32 to vector<8x1xf32>
    %156 = arith.divf %154, %155 : vector<8x1xf32>
    %157 = vector.broadcast %156 : vector<8x1xf32> to vector<8x32xf32>
    %158 = arith.subf %150, %157 : vector<8x32xf32>
    %159 = arith.mulf %158, %158 : vector<8x32xf32>
    %cst_53 = arith.constant dense<0.000000e+00> : vector<8xf32>
    %160 = vector.multi_reduction <add>, %159, %cst_53 [1] : vector<8x32xf32> to vector<8xf32>
    %161 = vector.shape_cast %160 : vector<8xf32> to vector<8x1xf32>
    %cst_54 = arith.constant 3.200000e+01 : f32
    %162 = vector.broadcast %cst_54 : f32 to vector<8x1xf32>
    %163 = arith.divf %161, %162 : vector<8x1xf32>
    %164 = vector.broadcast %156 : vector<8x1xf32> to vector<8x32xf32>
    %165 = arith.subf %150, %164 : vector<8x32xf32>
    %cst_55 = arith.constant 9.99999996E-13 : f32
    %166 = vector.broadcast %cst_55 : f32 to vector<8x1xf32>
    %167 = arith.addf %163, %166 : vector<8x1xf32>
    %168 = math.rsqrt %167 : vector<8x1xf32>
    %169 = vector.broadcast %168 : vector<8x1xf32> to vector<8x32xf32>
    %170 = arith.mulf %165, %169 : vector<8x32xf32>
    %171 = vector.broadcast %151 : vector<1x32xf32> to vector<8x32xf32>
    %172 = arith.mulf %170, %171 : vector<8x32xf32>
    %173 = vector.broadcast %152 : vector<1x32xf32> to vector<8x32xf32>
    %174 = arith.addf %172, %173 : vector<8x32xf32>
    %c1_56 = arith.constant 1 : index
    %c0_57 = arith.constant 0 : index
    %c0_58 = arith.constant 0 : index
    %175 = vector.load %arg10[%c1_56, %c0_57, %c0_58] : memref<2x6x32xf32, #tpu.memory_space<vmem>>, vector<1x6x32xf32>
    %176 = vector.shape_cast %175 : vector<1x6x32xf32> to vector<6x32xf32>
    %c1_59 = arith.constant 1 : index
    %c0_60 = arith.constant 0 : index
    %c0_61 = arith.constant 0 : index
    %177 = vector.load %arg4[%c1_59, %c0_60, %c0_61] : memref<2x32x96xf32, #tpu.memory_space<vmem>>, vector<1x32x96xf32>
    %178 = vector.shape_cast %177 : vector<1x32x96xf32> to vector<32x96xf32>
    %cst_62 = arith.constant dense<0.000000e+00> : vector<8x96xf32>
    %179 = tpu.matmul %174, %178, %cst_62 {dimension_numbers = #tpu.dot_dimension_numbers<[1], [0], [0], [1], [0, 0, 1, 1], [], []>} : vector<8x32xf32>, vector<32x96xf32>, vector<8x96xf32> -> vector<8x96xf32>
    %c1_63 = arith.constant 1 : index
    %c0_64 = arith.constant 0 : index
    %c0_65 = arith.constant 0 : index
    %180 = vector.load %arg5[%c1_63, %c0_64, %c0_65] : memref<2x1x96xf32, #tpu.memory_space<vmem>>, vector<1x1x96xf32>
    %181 = vector.shape_cast %180 : vector<1x1x96xf32> to vector<1x96xf32>
    %182 = vector.broadcast %181 : vector<1x96xf32> to vector<8x96xf32>
    %183 = arith.addf %179, %182 : vector<8x96xf32>
    %184 = vector.extract_strided_slice %183 {offsets = [0, 0], sizes = [8, 32], strides = [1, 1]} : vector<8x96xf32> to vector<8x32xf32>
    %185 = vector.extract_strided_slice %183 {offsets = [0, 32], sizes = [8, 32], strides = [1, 1]} : vector<8x96xf32> to vector<8x32xf32>
    %186 = vector.extract_strided_slice %183 {offsets = [0, 64], sizes = [8, 32], strides = [1, 1]} : vector<8x96xf32> to vector<8x32xf32>
    %187 = vector.extract_strided_slice %184 {offsets = [0, 0], sizes = [8, 8], strides = [1, 1]} : vector<8x32xf32> to vector<8x8xf32>
    %188 = vector.extract_strided_slice %184 {offsets = [0, 8], sizes = [8, 8], strides = [1, 1]} : vector<8x32xf32> to vector<8x8xf32>
    %189 = vector.extract_strided_slice %184 {offsets = [0, 16], sizes = [8, 8], strides = [1, 1]} : vector<8x32xf32> to vector<8x8xf32>
    %190 = vector.extract_strided_slice %184 {offsets = [0, 24], sizes = [8, 8], strides = [1, 1]} : vector<8x32xf32> to vector<8x8xf32>
    %191 = vector.shape_cast %187 : vector<8x8xf32> to vector<1x8x8xf32>
    %192 = vector.shape_cast %188 : vector<8x8xf32> to vector<1x8x8xf32>
    %193 = vector.shape_cast %189 : vector<8x8xf32> to vector<1x8x8xf32>
    %194 = vector.shape_cast %190 : vector<8x8xf32> to vector<1x8x8xf32>
    %195 = tpu.concatenate %191, %192, %193, %194 in 0 : vector<1x8x8xf32>, vector<1x8x8xf32>, vector<1x8x8xf32>, vector<1x8x8xf32> -> vector<4x8x8xf32>
    %196 = vector.extract_strided_slice %185 {offsets = [0, 0], sizes = [8, 8], strides = [1, 1]} : vector<8x32xf32> to vector<8x8xf32>
    %197 = vector.extract_strided_slice %185 {offsets = [0, 8], sizes = [8, 8], strides = [1, 1]} : vector<8x32xf32> to vector<8x8xf32>
    %198 = vector.extract_strided_slice %185 {offsets = [0, 16], sizes = [8, 8], strides = [1, 1]} : vector<8x32xf32> to vector<8x8xf32>
    %199 = vector.extract_strided_slice %185 {offsets = [0, 24], sizes = [8, 8], strides = [1, 1]} : vector<8x32xf32> to vector<8x8xf32>
    %200 = vector.shape_cast %196 : vector<8x8xf32> to vector<1x8x8xf32>
    %201 = vector.shape_cast %197 : vector<8x8xf32> to vector<1x8x8xf32>
    %202 = vector.shape_cast %198 : vector<8x8xf32> to vector<1x8x8xf32>
    %203 = vector.shape_cast %199 : vector<8x8xf32> to vector<1x8x8xf32>
    %204 = tpu.concatenate %200, %201, %202, %203 in 0 : vector<1x8x8xf32>, vector<1x8x8xf32>, vector<1x8x8xf32>, vector<1x8x8xf32> -> vector<4x8x8xf32>
    %205 = vector.extract_strided_slice %186 {offsets = [0, 0], sizes = [8, 8], strides = [1, 1]} : vector<8x32xf32> to vector<8x8xf32>
    %206 = vector.extract_strided_slice %186 {offsets = [0, 8], sizes = [8, 8], strides = [1, 1]} : vector<8x32xf32> to vector<8x8xf32>
    %207 = vector.extract_strided_slice %186 {offsets = [0, 16], sizes = [8, 8], strides = [1, 1]} : vector<8x32xf32> to vector<8x8xf32>
    %208 = vector.extract_strided_slice %186 {offsets = [0, 24], sizes = [8, 8], strides = [1, 1]} : vector<8x32xf32> to vector<8x8xf32>
    %209 = vector.shape_cast %205 : vector<8x8xf32> to vector<1x8x8xf32>
    %210 = vector.shape_cast %206 : vector<8x8xf32> to vector<1x8x8xf32>
    %211 = vector.shape_cast %207 : vector<8x8xf32> to vector<1x8x8xf32>
    %212 = vector.shape_cast %208 : vector<8x8xf32> to vector<1x8x8xf32>
    %213 = tpu.concatenate %209, %210, %211, %212 in 0 : vector<1x8x8xf32>, vector<1x8x8xf32>, vector<1x8x8xf32>, vector<1x8x8xf32> -> vector<4x8x8xf32>
    "tpu.trace_start"() <{level = 10 : i32, message = "hqd,hkd->hqk"}> : () -> ()
    %cst_66 = arith.constant dense<0.000000e+00> : vector<4x8x8xf32>
    %214 = tpu.matmul %195, %204, %cst_66 {dimension_numbers = #tpu.dot_dimension_numbers<[2], [2], [1], [1], [0, 0, 0, 1, 1, 1], [0], [0]>} : vector<4x8x8xf32>, vector<4x8x8xf32>, vector<4x8x8xf32> -> vector<4x8x8xf32>
    "tpu.trace_stop"() : () -> ()
    %cst_67 = arith.constant 0.353553385 : f32
    %215 = vector.broadcast %cst_67 : f32 to vector<4x8x8xf32>
    %216 = arith.mulf %214, %215 : vector<4x8x8xf32>
    %217 = arith.addf %216, %30 : vector<4x8x8xf32>
    %cst_68 = arith.constant dense<0xFF800000> : vector<4x8xf32>
    %218 = vector.multi_reduction <maximumf>, %217, %cst_68 [2] : vector<4x8x8xf32> to vector<4x8xf32>
    %219 = vector.shape_cast %218 : vector<4x8xf32> to vector<4x8x1xf32>
    %220 = vector.broadcast %219 : vector<4x8x1xf32> to vector<4x8x8xf32>
    %221 = arith.subf %217, %220 : vector<4x8x8xf32>
    %222 = math.exp %221 : vector<4x8x8xf32>
    %cst_69 = arith.constant dense<0.000000e+00> : vector<4x8xf32>
    %223 = vector.multi_reduction <add>, %222, %cst_69 [2] : vector<4x8x8xf32> to vector<4x8xf32>
    %224 = vector.shape_cast %223 : vector<4x8xf32> to vector<4x8x1xf32>
    %225 = vector.broadcast %224 : vector<4x8x1xf32> to vector<4x8x8xf32>
    %226 = arith.divf %222, %225 : vector<4x8x8xf32>
    "tpu.trace_start"() <{level = 10 : i32, message = "hqk,hkd->hqd"}> : () -> ()
    %cst_70 = arith.constant dense<0.000000e+00> : vector<4x8x8xf32>
    %227 = tpu.matmul %226, %213, %cst_70 {dimension_numbers = #tpu.dot_dimension_numbers<[2], [1], [1], [2], [0, 0, 0, 1, 1, 2], [0], [0]>} : vector<4x8x8xf32>, vector<4x8x8xf32>, vector<4x8x8xf32> -> vector<4x8x8xf32>
    "tpu.trace_stop"() : () -> ()
    %228 = vector.extract_strided_slice %227 {offsets = [0, 0, 0], sizes = [1, 8, 8], strides = [1, 1, 1]} : vector<4x8x8xf32> to vector<1x8x8xf32>
    %229 = vector.shape_cast %228 : vector<1x8x8xf32> to vector<8x8xf32>
    %230 = vector.extract_strided_slice %227 {offsets = [1, 0, 0], sizes = [1, 8, 8], strides = [1, 1, 1]} : vector<4x8x8xf32> to vector<1x8x8xf32>
    %231 = vector.shape_cast %230 : vector<1x8x8xf32> to vector<8x8xf32>
    %232 = vector.extract_strided_slice %227 {offsets = [2, 0, 0], sizes = [1, 8, 8], strides = [1, 1, 1]} : vector<4x8x8xf32> to vector<1x8x8xf32>
    %233 = vector.shape_cast %232 : vector<1x8x8xf32> to vector<8x8xf32>
    %234 = vector.extract_strided_slice %227 {offsets = [3, 0, 0], sizes = [1, 8, 8], strides = [1, 1, 1]} : vector<4x8x8xf32> to vector<1x8x8xf32>
    %235 = vector.shape_cast %234 : vector<1x8x8xf32> to vector<8x8xf32>
    %236 = tpu.concatenate %229, %231, %233, %235 in 1 : vector<8x8xf32>, vector<8x8xf32>, vector<8x8xf32>, vector<8x8xf32> -> vector<8x32xf32>
    %c1_71 = arith.constant 1 : index
    %c0_72 = arith.constant 0 : index
    %c0_73 = arith.constant 0 : index
    %237 = vector.load %arg6[%c1_71, %c0_72, %c0_73] : memref<2x32x32xf32, #tpu.memory_space<vmem>>, vector<1x32x32xf32>
    %238 = vector.shape_cast %237 : vector<1x32x32xf32> to vector<32x32xf32>
    %cst_74 = arith.constant dense<0.000000e+00> : vector<8x32xf32>
    %239 = tpu.matmul %236, %238, %cst_74 {dimension_numbers = #tpu.dot_dimension_numbers<[1], [0], [0], [1], [0, 0, 1, 1], [], []>} : vector<8x32xf32>, vector<32x32xf32>, vector<8x32xf32> -> vector<8x32xf32>
    %240 = vector.extract_strided_slice %176 {offsets = [4, 0], sizes = [1, 32], strides = [1, 1]} : vector<6x32xf32> to vector<1x32xf32>
    %241 = vector.broadcast %240 : vector<1x32xf32> to vector<8x32xf32>
    %242 = arith.addf %239, %241 : vector<8x32xf32>
    %243 = arith.addf %174, %242 : vector<8x32xf32>
    %244 = vector.extract_strided_slice %176 {offsets = [0, 0], sizes = [1, 32], strides = [1, 1]} : vector<6x32xf32> to vector<1x32xf32>
    %245 = vector.extract_strided_slice %176 {offsets = [1, 0], sizes = [1, 32], strides = [1, 1]} : vector<6x32xf32> to vector<1x32xf32>
    %cst_75 = arith.constant dense<0.000000e+00> : vector<8xf32>
    %246 = vector.multi_reduction <add>, %243, %cst_75 [1] : vector<8x32xf32> to vector<8xf32>
    %247 = vector.shape_cast %246 : vector<8xf32> to vector<8x1xf32>
    %cst_76 = arith.constant 3.200000e+01 : f32
    %248 = vector.broadcast %cst_76 : f32 to vector<8x1xf32>
    %249 = arith.divf %247, %248 : vector<8x1xf32>
    %250 = vector.broadcast %249 : vector<8x1xf32> to vector<8x32xf32>
    %251 = arith.subf %243, %250 : vector<8x32xf32>
    %252 = arith.mulf %251, %251 : vector<8x32xf32>
    %cst_77 = arith.constant dense<0.000000e+00> : vector<8xf32>
    %253 = vector.multi_reduction <add>, %252, %cst_77 [1] : vector<8x32xf32> to vector<8xf32>
    %254 = vector.shape_cast %253 : vector<8xf32> to vector<8x1xf32>
    %cst_78 = arith.constant 3.200000e+01 : f32
    %255 = vector.broadcast %cst_78 : f32 to vector<8x1xf32>
    %256 = arith.divf %254, %255 : vector<8x1xf32>
    %257 = vector.broadcast %249 : vector<8x1xf32> to vector<8x32xf32>
    %258 = arith.subf %243, %257 : vector<8x32xf32>
    %cst_79 = arith.constant 9.99999996E-13 : f32
    %259 = vector.broadcast %cst_79 : f32 to vector<8x1xf32>
    %260 = arith.addf %256, %259 : vector<8x1xf32>
    %261 = math.rsqrt %260 : vector<8x1xf32>
    %262 = vector.broadcast %261 : vector<8x1xf32> to vector<8x32xf32>
    %263 = arith.mulf %258, %262 : vector<8x32xf32>
    %264 = vector.broadcast %244 : vector<1x32xf32> to vector<8x32xf32>
    %265 = arith.mulf %263, %264 : vector<8x32xf32>
    %266 = vector.broadcast %245 : vector<1x32xf32> to vector<8x32xf32>
    %267 = arith.addf %265, %266 : vector<8x32xf32>
    %c1_80 = arith.constant 1 : index
    %c0_81 = arith.constant 0 : index
    %c0_82 = arith.constant 0 : index
    %268 = vector.load %arg7[%c1_80, %c0_81, %c0_82] : memref<2x32x64xf32, #tpu.memory_space<vmem>>, vector<1x32x64xf32>
    %269 = vector.shape_cast %268 : vector<1x32x64xf32> to vector<32x64xf32>
    %cst_83 = arith.constant dense<0.000000e+00> : vector<8x64xf32>
    %270 = tpu.matmul %267, %269, %cst_83 {dimension_numbers = #tpu.dot_dimension_numbers<[1], [0], [0], [1], [0, 0, 1, 1], [], []>} : vector<8x32xf32>, vector<32x64xf32>, vector<8x64xf32> -> vector<8x64xf32>
    %c1_84 = arith.constant 1 : index
    %c0_85 = arith.constant 0 : index
    %c0_86 = arith.constant 0 : index
    %271 = vector.load %arg8[%c1_84, %c0_85, %c0_86] : memref<2x1x64xf32, #tpu.memory_space<vmem>>, vector<1x1x64xf32>
    %272 = vector.shape_cast %271 : vector<1x1x64xf32> to vector<1x64xf32>
    %273 = vector.broadcast %272 : vector<1x64xf32> to vector<8x64xf32>
    %274 = arith.addf %270, %273 : vector<8x64xf32>
    %275 = arith.mulf %274, %274 : vector<8x64xf32>
    %276 = arith.mulf %274, %275 : vector<8x64xf32>
    %cst_87 = arith.constant 4.471500e-02 : f32
    %277 = vector.broadcast %cst_87 : f32 to vector<8x64xf32>
    %278 = arith.mulf %277, %276 : vector<8x64xf32>
    %279 = arith.addf %274, %278 : vector<8x64xf32>
    %cst_88 = arith.constant 0.797884583 : f32
    %280 = vector.broadcast %cst_88 : f32 to vector<8x64xf32>
    %281 = arith.mulf %280, %279 : vector<8x64xf32>
    %282 = math.tanh %281 : vector<8x64xf32>
    %cst_89 = arith.constant 1.000000e+00 : f32
    %283 = vector.broadcast %cst_89 : f32 to vector<8x64xf32>
    %284 = arith.addf %283, %282 : vector<8x64xf32>
    %cst_90 = arith.constant 5.000000e-01 : f32
    %285 = vector.broadcast %cst_90 : f32 to vector<8x64xf32>
    %286 = arith.mulf %285, %284 : vector<8x64xf32>
    %287 = arith.mulf %274, %286 : vector<8x64xf32>
    %c1_91 = arith.constant 1 : index
    %c0_92 = arith.constant 0 : index
    %c0_93 = arith.constant 0 : index
    %288 = vector.load %arg9[%c1_91, %c0_92, %c0_93] : memref<2x64x32xf32, #tpu.memory_space<vmem>>, vector<1x64x32xf32>
    %289 = vector.shape_cast %288 : vector<1x64x32xf32> to vector<64x32xf32>
    %cst_94 = arith.constant dense<0.000000e+00> : vector<8x32xf32>
    %290 = tpu.matmul %287, %289, %cst_94 {dimension_numbers = #tpu.dot_dimension_numbers<[1], [0], [0], [1], [0, 0, 1, 1], [], []>} : vector<8x64xf32>, vector<64x32xf32>, vector<8x32xf32> -> vector<8x32xf32>
    %291 = vector.extract_strided_slice %176 {offsets = [5, 0], sizes = [1, 32], strides = [1, 1]} : vector<6x32xf32> to vector<1x32xf32>
    %292 = vector.broadcast %291 : vector<1x32xf32> to vector<8x32xf32>
    %293 = arith.addf %290, %292 : vector<8x32xf32>
    %294 = arith.addf %267, %293 : vector<8x32xf32>
    %295 = vector.extract_strided_slice %176 {offsets = [2, 0], sizes = [1, 32], strides = [1, 1]} : vector<6x32xf32> to vector<1x32xf32>
    %296 = vector.extract_strided_slice %176 {offsets = [3, 0], sizes = [1, 32], strides = [1, 1]} : vector<6x32xf32> to vector<1x32xf32>
    %cst_95 = arith.constant dense<0.000000e+00> : vector<8xf32>
    %297 = vector.multi_reduction <add>, %294, %cst_95 [1] : vector<8x32xf32> to vector<8xf32>
    %298 = vector.shape_cast %297 : vector<8xf32> to vector<8x1xf32>
    %cst_96 = arith.constant 3.200000e+01 : f32
    %299 = vector.broadcast %cst_96 : f32 to vector<8x1xf32>
    %300 = arith.divf %298, %299 : vector<8x1xf32>
    %301 = vector.broadcast %300 : vector<8x1xf32> to vector<8x32xf32>
    %302 = arith.subf %294, %301 : vector<8x32xf32>
    %303 = arith.mulf %302, %302 : vector<8x32xf32>
    %cst_97 = arith.constant dense<0.000000e+00> : vector<8xf32>
    %304 = vector.multi_reduction <add>, %303, %cst_97 [1] : vector<8x32xf32> to vector<8xf32>
    %305 = vector.shape_cast %304 : vector<8xf32> to vector<8x1xf32>
    %cst_98 = arith.constant 3.200000e+01 : f32
    %306 = vector.broadcast %cst_98 : f32 to vector<8x1xf32>
    %307 = arith.divf %305, %306 : vector<8x1xf32>
    %308 = vector.broadcast %300 : vector<8x1xf32> to vector<8x32xf32>
    %309 = arith.subf %294, %308 : vector<8x32xf32>
    %cst_99 = arith.constant 9.99999996E-13 : f32
    %310 = vector.broadcast %cst_99 : f32 to vector<8x1xf32>
    %311 = arith.addf %307, %310 : vector<8x1xf32>
    %312 = math.rsqrt %311 : vector<8x1xf32>
    %313 = vector.broadcast %312 : vector<8x1xf32> to vector<8x32xf32>
    %314 = arith.mulf %309, %313 : vector<8x32xf32>
    %315 = vector.broadcast %295 : vector<1x32xf32> to vector<8x32xf32>
    %316 = arith.mulf %314, %315 : vector<8x32xf32>
    %317 = vector.broadcast %296 : vector<1x32xf32> to vector<8x32xf32>
    %318 = arith.addf %316, %317 : vector<8x32xf32>
    %c0_100 = arith.constant 0 : index
    %c0_101 = arith.constant 0 : index
    %c0_102 = arith.constant 0 : index
    %319 = vector.load %arg11[%c0_100, %c0_101, %c0_102] : memref<1x8x32xf32, #tpu.memory_space<vmem>>, vector<1x8x32xf32>
    %320 = vector.shape_cast %319 : vector<1x8x32xf32> to vector<8x32xf32>
    %321 = vector.shape_cast %318 : vector<8x32xf32> to vector<1x8x32xf32>
    tpu.vector_store %arg11[%c0_100, %c0_101, %c0_102], %321 {strides = array<i32>} : memref<1x8x32xf32, #tpu.memory_space<vmem>>, vector<1x8x32xf32>,
    return
  }
  func.func @transform_0(%arg0: i32) -> (i32, i32, i32) {
    %c0_i32 = arith.constant 0 : i32
    %c0_i32_0 = arith.constant 0 : i32
    %c0_i32_1 = arith.constant 0 : i32
    return %arg0, %c0_i32, %c0_i32_0 : i32, i32, i32
  }
  func.func @transform_1(%arg0: i32) -> (i32, i32, i32) {
    %c0_i32 = arith.constant 0 : i32
    %c0_i32_0 = arith.constant 0 : i32
    %c0_i32_1 = arith.constant 0 : i32
    return %arg0, %c0_i32, %c0_i32_0 : i32, i32, i32
  }
  func.func @transform_2(%arg0: i32) -> (i32, i32) {
    %c0_i32 = arith.constant 0 : i32
    %c0_i32_0 = arith.constant 0 : i32
    %c0_i32_1 = arith.constant 0 : i32
    return %c0_i32, %c0_i32_0 : i32, i32
  }
  func.func @transform_3(%arg0: i32) -> (i32, i32, i32) {
    %c0_i32 = arith.constant 0 : i32
    %c0_i32_0 = arith.constant 0 : i32
    %c0_i32_1 = arith.constant 0 : i32
    %c0_i32_2 = arith.constant 0 : i32
    return %c0_i32, %c0_i32_0, %c0_i32_1 : i32, i32, i32
  }
  func.func @transform_4(%arg0: i32) -> (i32, i32, i32) {
    %c0_i32 = arith.constant 0 : i32
    %c0_i32_0 = arith.constant 0 : i32
    %c0_i32_1 = arith.constant 0 : i32
    %c0_i32_2 = arith.constant 0 : i32
    return %c0_i32, %c0_i32_0, %c0_i32_1 : i32, i32, i32
  }
  func.func @transform_5(%arg0: i32) -> (i32, i32, i32) {
    %c0_i32 = arith.constant 0 : i32
    %c0_i32_0 = arith.constant 0 : i32
    %c0_i32_1 = arith.constant 0 : i32
    %c0_i32_2 = arith.constant 0 : i32
    return %c0_i32, %c0_i32_0, %c0_i32_1 : i32, i32, i32
  }
  func.func @transform_6(%arg0: i32) -> (i32, i32, i32) {
    %c0_i32 = arith.constant 0 : i32
    %c0_i32_0 = arith.constant 0 : i32
    %c0_i32_1 = arith.constant 0 : i32
    %c0_i32_2 = arith.constant 0 : i32
    return %c0_i32, %c0_i32_0, %c0_i32_1 : i32, i32, i32
  }
  func.func @transform_7(%arg0: i32) -> (i32, i32, i32) {
    %c0_i32 = arith.constant 0 : i32
    %c0_i32_0 = arith.constant 0 : i32
    %c0_i32_1 = arith.constant 0 : i32
    %c0_i32_2 = arith.constant 0 : i32
    return %c0_i32, %c0_i32_0, %c0_i32_1 : i32, i32, i32
  }
  func.func @transform_8(%arg0: i32) -> (i32, i32, i32) {
    %c0_i32 = arith.constant 0 : i32
    %c0_i32_0 = arith.constant 0 : i32
    %c0_i32_1 = arith.constant 0 : i32
    %c0_i32_2 = arith.constant 0 : i32
    return %c0_i32, %c0_i32_0, %c0_i32_1 : i32, i32, i32
  }
  func.func @transform_9(%arg0: i32) -> (i32, i32, i32) {
    %c0_i32 = arith.constant 0 : i32
    %c0_i32_0 = arith.constant 0 : i32
    %c0_i32_1 = arith.constant 0 : i32
    %c0_i32_2 = arith.constant 0 : i32
    return %c0_i32, %c0_i32_0, %c0_i32_1 : i32, i32, i32
  }
  func.func @transform_10(%arg0: i32) -> (i32, i32, i32) {
    %c0_i32 = arith.constant 0 : i32
    %c0_i32_0 = arith.constant 0 : i32
    %c0_i32_1 = arith.constant 0 : i32
    return %arg0, %c0_i32, %c0_i32_0 : i32, i32, i32
  }
}

</mosaic_0001>

<bundles_post_ra>
// kernel: tpu_custom_call.1
= control target key start
LH: loop header
LB: loop body
LE: loop exit
PB: predicated region body
PF: predicated region fallthrough
CT: control target
= control target key end

     0   :  { %15 = vsyncpa [#allocation3], 0  ;;  %s3801_s0 = inlined_call_operand.vmem [shape: f32[2,8,32], index: 0, kind: input, shape index: {}]   ;;  %s3802_s1 = inlined_call_operand.vmem [shape: f32[2,1,8], index: 1, kind: input, shape index: {}]   ;;  %s3803_s2 = inlined_call_operand.vmem [shape: f32[2,32], index: 2, kind: input, shape index: {}]   ;;  %s3804_s3 = inlined_call_operand.vmem [shape: f32[2,32,96], index: 3, kind: input, shape index: {}]   ;;  %s3805_s4 = inlined_call_operand.vmem [shape: f32[2,1,96], index: 4, kind: input, shape index: {}]   ;;  %s3806_s5 = inlined_call_operand.vmem [shape: f32[2,32,32], index: 5, kind: input, shape index: {}]   ;;  %s3807_s6 = inlined_call_operand.vmem [shape: f32[2,32,64], index: 6, kind: input, shape index: {}]   ;;  %s3808_s7 = inlined_call_operand.vmem [shape: f32[2,1,64], index: 7, kind: input, shape index: {}]   ;;  %s3809_s8 = inlined_call_operand.vmem [shape: f32[2,64,32], index: 8, kind: input, shape index: {}]   ;;  %s3810_s9 = inlined_call_operand.vmem [shape: f32[2,6,32], index: 9, kind: input, shape index: {}]   ;;  %s3811_s10 = inlined_call_operand.hbm [shape: f32[2,8,32], index: 10, kind: output, shape index: {}]  }
   0x1   :  { %17 = vsyncpa [#allocation3 + $0x1], 0  ;;  %s3269_s13 = smov 0   ;;  %s3271_s14 = smov 0  }
   0x2   :  { %s3273_s15 = smov 0   ;;  %s3275_s16 = smov 0  }
   0x3 LB: > { %s3290_s17 = sadd.s32 4294967295, %s3200_s16   ;;  %s2646_s18 = sadd.s32 4294967294, %s3200_s16   ;;  %s3200_s16 = sphi %s3275_s16, %s3829_s16   ;;  %s3196_s15 = sphi %s3273_s15, %s3828_s15   ;;  %s3192_s14 = sphi %s3271_s14, %s3827_s14   ;;  %s3188_s13 = sphi %s3269_s13, %s3826_s13  }
   0x4   : > { %s3294_s19 = sadd.s32 1, %s3200_s16   ;;  %s250_s20 = sadd.s32 1, %s3196_s15 }
   0x5   : > { %s247_s21 = ssub.s32 %s3200_s16, %s3294_s19  ;;  %p260_p0 = scmp.ne.s32.totalorder %s3196_s15, %s3192_s14 }
   0x6   : > { %p248_p1 = scmp.eq.s32.totalorder %s247_s21, 0  ;;  %p261_p2 = scmp.eq.s32.totalorder %s3290_s17, 1 }
   0x7   : > { %p266_p3 = scmp.ne.s32.totalorder %s3192_s14, %s3188_s13  ;;  %p267_p4 = scmp.eq.s32.totalorder %s2646_s18, 1 }
   0x8   : > { %s3305_s22 = scalar_select %p248_p1, %s3196_s15, %s250_s20  }
   0x9   : > { %p3307_p5 = por %p261_p2, %p260_p0  ;;  %p3311_p6 = por %p267_p4, %p266_p3 }
   0xa   : > { %p2649_p7 = scmp.ge.s32.totalorder %s3200_s16, 1  ;;  %p322_p8 = scmp.lt.s32.totalorder %s3200_s16, 3 }
   0xc   : > { %p323_p9 = pnand %p2649_p7, %p322_p8 }
   0xd   : > { %p362_p10 = scmp.lt.s32.totalorder (!%p323_p9), %s3290_s17, 1  ;;  %vm372_vm0 = vcmask (!%p323_p9), 261120   ;;  %v405_v7 = vld [vmem:[%s3804_s3] sm:$0xff] (!%p323_p9)  ;;  %v406_v8 = vld [vmem:[%s3804_s3 + $0x8] sm:$0xff] (!%p323_p9)  ;;  %v407_v9 = vld [vmem:[%s3804_s3 + $0x10] sm:$0xff] (!%p323_p9)  ;;  %v3202_v10 = vmov (!%p323_p9), 0.0|0.0  }
   0xe   : > { %326 = sbr.rel (%p323_p9) target bundleno = 5574 (0x15c6), region = 60  ;;  %2982 = vmatprep.subr.bf16.mxu1 (!%p323_p9), %v3202_v10  ;;  %v2983_v11 = vpack.c.bf16 (!%p323_p9), %v406_v8, %v405_v7  ;;  %v408_v12 = vld [vmem:[%s3804_s3 + $0x18] sm:$0xff] (!%p323_p9)  ;;  %vm3203_vm1 = vmmov (!%p323_p9), 0   ;;  %v3204_v13 = vmov (!%p323_p9), 0.0   ;;  %v2652_v19 = vld [vmem:[%s3803_s2] ss:$0 sm:$0xff] (!%p323_p9) }
   0xf   : > { %2806 = vmatprep.mubr.msk.f32.mxu1 (!%p323_p9), %vm3203_vm1, %v3204_v13  ;;  %2819 = vmatprep.subr.mxu0 (!%p323_p9), %v3204_v13  ;;  %v2986_v14 = vpack.c.bf16 (!%p323_p9), %v408_v12, %v407_v9  ;;  %v2653_v21 = vld [vmem:[%s3803_s2 + $0x1] ss:$0 sm:$0xff] (!%p323_p9)  ;;  %v2655_v24 = vld [vmem:[%s3805_s4] ss:$0 sm:$0xff] (!%p323_p9)  ;;  %s3205_s20 = smov (!%p323_p9), 104   ;;  %s3206_s21 = smov (!%p323_p9), 120  }
  0x10   : > { %2821 = vmatprep.mubr.msk.f32.mxu0 (!%p323_p9), %vm3203_vm1, %v3204_v13  ;;  %2984 = vmatpush3.bf16.msra.mxu1 (!%p323_p9), %v2983_v11  ;;  %s3814_s27 = smov (!%p323_p9), 96   ;;  %vm498_vm2 = vcmask (!%p323_p9), 64512   ;;  %s3817_s11 = smov (!%p323_p9), 8   ;;  %vm1170_vm3 = vcmask (!%p323_p9), 130048   ;;  %vm1172_vm4 = vcmask (!%p323_p9), 195584   ;;  %vm1384_vm5 = vcmask (!%p323_p9), 523264  }
  0x11   : > { %2985 = vmatprep.subr.bf16.mxu1 (!%p323_p9), %v3202_v10  ;;  %s3818_s12 = smov (!%p323_p9), 16   ;;  %s3816_s18 = smov (!%p323_p9), 24  }
  0x12   : > { %s3823_s28 = smov (!%p323_p9), 16  }
  0x14   : > { %2987 = vmatpush3.bf16.msra.mxu1 (!%p323_p9), %v2986_v14 }
  0x15   : > { %s3319_s25 = scalar_select %p362_p10, %s3290_s17, 1  ;;  %2809 = vmatprep.subr.mxu1 %v3204_v13 }
  0x17   : > { %s2651_s26 = sshll.u32 %s3319_s25, 3  ;;  %s368_s30 = scalar_lea.vmem %s3802_s1, %s3319_s25 }
  0x18   : > { %s365_s29 = scalar_lea.vmem %s3801_s0, %s2651_s26  ;;  %s3207_s26 = smov 112   ;;  %v3412_v35 = vld [vmem:[%s368_s30] ss:$0 sm:$0xff] }
  0x19   : > { %v369_v0 = vld [vmem:[%s365_s29] sm:$0xff]  ;;  %s3812_s25 = smov 64   ;;  %s3821_s29 = smov 96  }
  0x1a   : > { %v373_v1 = vsel %vm372_vm0, %v369_v0, 0.0 }
  0x1b   : > { %374 = vadd.xlane.f32.xlu0 %v373_v1 }
  0xa8   : > { %v375_v2 = vpop.xlane.xlu0 %374 }
  0xa9   : > { %v377_v3 = vmul.f32 0.03125, %v375_v2 }
  0xab   : > { %v378_v4 = vsub.f32 %v369_v0, %v377_v3 }
  0xad   : > { %v379_v5 = vmul.f32 %v378_v4, %v378_v4 }
  0xaf   : > { %v380_v6 = vsel %vm372_vm0, %v379_v5, 0.0 }
  0xb0   : > { %381 = vadd.xlane.f32.xlu0 %v380_v6 }
 0x13d   : > { %v382_v15 = vpop.xlane.xlu0 %381 }
 0x13e   : > { %v383_v16 = vmul.f32 0.03125, %v382_v15 }
 0x140   : > { %v384_v17 = vadd.f32 1e-12, %v383_v16 }
 0x142   : > { %3092 = vrsqrt.f32 %v384_v17 }
 0x14c   : > { %v3093_v18 = vpop.eup %3092 }
 0x14d   : > { %v386_v20 = vmul.f32 %v3093_v18, %v378_v4 }
 0x14f   : > { %v391_v22 = vmul.f32 %v2652_v19, %v386_v20 }
 0x151   : > { %v3353_v23 = vadd.f32 %v2653_v21, %v391_v22 }
 0x153   : > { %2807 = vmatmul.mubr.msk.f32.vlgmr.msra.gmra.mrb[0].mxu1 %vm372_vm0, %v3353_v23 }
 0x154   : > { %2811 = vmatprep.mubr.msk.f32.mxu1 %vm3203_vm1, %v3204_v13 }
 0x226   : > { %v485_v25 = vpop.f32.mrb[0].mxu1 }
 0x227   : > { %v3362_v26 = vadd.f32 %v2655_v24, %v485_v25  ;;  %v2808_v27 = vpop.f32.mrb[1].mxu1 }
 0x229   : > { %494 = vrot.lane.b32.xlu0 %v3362_v26, %s3205_s20  ;;  %490 = vrot.lane.b32.xlu1 %v3362_v26, %s3206_s21 }
 0x22d   : > { %492 = vrot.lane.b32.xlu1 %v3362_v26, %s3207_s26 }
 0x231   : > { %496 = vrot.lane.b32.xlu1 %v3362_v26, %s3814_s27 }
 0x29b   : > { %v3372_v28 = vpop.permute.xlu1 %490  ;;  %v3380_v30 = vpop.permute.xlu0 %494 }
 0x29c   : > { %573 = vrot.lane.b32.xlu1 %v3372_v28, %s3814_s27 }
 0x29f   : > { %v3376_v29 = vpop.permute.xlu1 %492 }
 0x2a0   : > { %649 = vrot.lane.b32.xlu1 %v3376_v29, %s3814_s27 }
 0x2a3   : > { %v497_v31 = vpop.permute.xlu1 %496 }
 0x2a4   : > { %725 = vrot.lane.b32.xlu1 %v3380_v30, %s3814_s27  ;;  %2810 = vmatpush3.xpose.msk.msra.mxu1 %vm498_vm2, %v497_v31 }
 0x2a5   : > { %2814 = vmatprep.subr.mxu1 %v3204_v13 }
 0x2a7   : > { %2812 = vmatmul.mubr.msk.f32.vlgmr.msra.gmra.mrb[2].mxu1 %vm498_vm2, %v3362_v26 }
 0x2a8   : > { %2816 = vmatprep.mubr.msk.f32.mxu1 %vm3203_vm1, %v3204_v13 }
 0x30e   : > { %v574_v32 = vpop.permute.xlu1 %573 }
 0x30f   : > { %2815 = vmatpush3.xpose.msk.msra.mxu1 %vm498_vm2, %v574_v32 }
 0x310   : > { %2824 = vmatprep.subr.mxu1 %v3204_v13 }
 0x312   : > { %2817 = vmatmul.mubr.msk.f32.vlgmr.msra.gmra.mrb[4].mxu1 %vm498_vm2, %v3372_v28  ;;  %v650_v33 = vpop.permute.xlu1 %649 }
 0x313   : > { %2820 = vmatpush3.xpose.msk.msra.mxu0 %vm498_vm2, %v650_v33  ;;  %2826 = vmatprep.mubr.msk.f32.mxu1 %vm3203_vm1, %v3204_v13  ;;  %v1174_v33 = vld [vmem:[%s3806_s5] sm:$0xff] }
 0x314   : > { %2829 = vmatprep.subr.mxu0 %v3204_v13 }
 0x316   : > { %2822 = vmatmul.mubr.msk.f32.vlgmr.msra.gmra.mrb[0].mxu0 %vm498_vm2, %v3376_v29  ;;  %v726_v34 = vpop.permute.xlu1 %725 }
 0x317   : > { %2825 = vmatpush3.xpose.msk.msra.mxu1 %vm498_vm2, %v726_v34  ;;  %2831 = vmatprep.mubr.msk.f32.mxu0 %vm3203_vm1, %v3204_v13  ;;  %v1175_v34 = vld [vmem:[%s3806_s5 + $0x8] sm:$0xff] }
 0x318   : > { %2834 = vmatprep.subr.mxu1 %v3204_v13 }
 0x31a   : > { %2827 = vmatmul.mubr.msk.f32.vlgmr.msra.gmra.mrb[6].mxu1 %vm498_vm2, %v3380_v30 }
 0x31b   : > { %2836 = vmatprep.mubr.msk.f32.mxu1 %vm3203_vm1, %v3204_v13 }
 0x37a   : > { %v569_v36 = vpop.f32.mrb[2].mxu1 }
 0x37b   : > { %v801_v37 = vmul.f32 0.35355338, %v569_v36  ;;  %v2813_v38 = vpop.f32.mrb[3].mxu1  ;;  %v2989_v36 = vpack.c.bf16 %v1175_v34, %v1174_v33  ;;  %v2670_v34 = vld [vmem:[%s3808_s7] ss:$0 sm:$0xff] }
 0x37c   : > { %v1177_v38 = vld [vmem:[%s3806_s5 + $0x18] sm:$0xff] }
 0x37d   : > { %v805_v39 = vadd.f32 %v3412_v35, %v801_v37  ;;  %v1176_v37 = vld [vmem:[%s3806_s5 + $0x10] sm:$0xff] }
 0x37f   : > { %v809_v40 = vsel %vm498_vm2, %v805_v39, -inf }
 0x380   : > { %810 = vmax.xlane.f32.xlu1 %v809_v40 }
 0x3e5   : > { %v645_v41 = vpop.f32.mrb[4].mxu1 }
 0x3e6   : > { %v802_v42 = vmul.f32 0.35355338, %v645_v41  ;;  %v2818_v43 = vpop.f32.mrb[5].mxu1 }
 0x3e8   : > { %v806_v44 = vadd.f32 %v3412_v35, %v802_v42 }
 0x3e9   : > { %v721_v45 = vpop.f32.mrb[0].mxu0 }
 0x3ea   : > { %v803_v46 = vmul.f32 0.35355338, %v721_v45  ;;  %v2823_v47 = vpop.f32.mrb[1].mxu0  ;;  %v812_v48 = vsel %vm498_vm2, %v806_v44, -inf }
 0x3eb   : > { %813 = vmax.xlane.f32.xlu0 %v812_v48 }
 0x3ec   : > { %v807_v49 = vadd.f32 %v3412_v35, %v803_v46 }
 0x3ed   : > { %v797_v50 = vpop.f32.mrb[6].mxu1 }
 0x3ee   : > { %v804_v51 = vmul.f32 0.35355338, %v797_v50  ;;  %v2828_v52 = vpop.f32.mrb[7].mxu1  ;;  %v815_v53 = vsel %vm498_vm2, %v807_v49, -inf }
 0x3ef   : > { %816 = vmax.xlane.f32.xlu1 %v815_v53  ;;  %v1178_v52 = vlaneseq }
 0x3f0   : > { %v808_v54 = vadd.f32 %v3412_v35, %v804_v51 }
 0x3f1   : > { %v3473_v53 = vshrl.u32 %v1178_v52, 7 }
 0x3f2   : > { %v818_v55 = vsel %vm498_vm2, %v808_v54, -inf }
 0x3f3   : > { %819 = vmax.xlane.f32.xlu0 %v818_v55  ;;  %v3479_v55 = vld [vmem:[%s3810_s9] sm:$0x3f] }
 0x400   : > { %853 = vrot.lane.b32.xlu1 %v3362_v26, %s3812_s25 }
 0x40d   : > { %v811_v56 = vpop.xlane.xlu1 %810 }
 0x40e   : > { %v821_v57 = vsub.f32 %v805_v39, %v811_v56  ;;  %v2992_v39 = vpack.c.bf16 %v1177_v38, %v1176_v37 }
 0x410   : > { %v825_v58 = vmul.f32 1.442695, %v821_v57 }
 0x412   : > { %3094 = vpow2.f32 %v825_v58 }
 0x41c   : > { %v3095_v59 = vpop.eup %3094 }
 0x41d   : > { %v833_v60 = vsel %vm498_vm2, %v3095_v59, 0.0 }
 0x424   : > { %834 = vadd.xlane.f32.xlu1 %v833_v60 }
 0x478   : > { %v814_v61 = vpop.xlane.xlu0 %813 }
 0x479   : > { %v822_v62 = vsub.f32 %v806_v44, %v814_v61 }
 0x47b   : > { %v827_v63 = vmul.f32 1.442695, %v822_v62 }
 0x47c   : > { %v817_v0 = vpop.xlane.xlu1 %816 }
 0x47d   : > { %3096 = vpow2.f32 %v827_v63  ;;  %v823_v1 = vsub.f32 %v807_v49, %v817_v0 }
 0x47f   : > { %v829_v2 = vmul.f32 1.442695, %v823_v1 }
 0x480   : > { %v854_v3 = vpop.permute.xlu1 %853  ;;  %v820_v4 = vpop.xlane.xlu0 %819 }
 0x481   : > { %3098 = vpow2.f32 %v829_v2  ;;  %v824_v5 = vsub.f32 %v808_v54, %v820_v4  ;;  %2830 = vmatpush3.msra.mxu0 %v854_v3  ;;  %v1180_v54 = vsub.s32 4, %v3473_v53  ;;  %v1279_v3 = vld [vmem:[%s3807_s6] sm:$0xff]  ;;  %v1280_v4 = vld [vmem:[%s3807_s6 + $0x8] sm:$0xff] }
 0x482   : > { %2839 = vmatprep.subr.mxu0 %v3204_v13 }
 0x483   : > { %v831_v6 = vmul.f32 1.442695, %v824_v5  ;;  %v1181_v56 = vrot.slane %v3479_v55, %v1180_v54  ;;  %v2995_v5 = vpack.c.bf16 %v1280_v4, %v1279_v3  ;;  %v2677_v3 = vld [vmem:[%s3804_s3 + $0x38] sm:$0xff] }
 0x485   : > { %3100 = vpow2.f32 %v831_v6  ;;  %v1282_v6 = vld [vmem:[%s3807_s6 + $0x18] sm:$0xff] }
 0x487   : > { %v3097_v7 = vpop.eup %3096 }
 0x488   : > { %v836_v8 = vsel %vm498_vm2, %v3097_v7, 0.0 }
 0x489   : > { %837 = vadd.xlane.f32.xlu0 %v836_v8 }
 0x48b   : > { %v3099_v9 = vpop.eup %3098 }
 0x48c   : > { %v839_v11 = vsel %vm498_vm2, %v3099_v9, 0.0 }
 0x48d   : > { %840 = vadd.xlane.f32.xlu1 %v839_v11 }
 0x48f   : > { %v3101_v12 = vpop.eup %3100 }
 0x490   : > { %v842_v14 = vsel %vm498_vm2, %v3101_v12, 0.0 }
 0x491   : > { %843 = vadd.xlane.f32.xlu0 %v842_v14  ;;  %v1276_v14 = vsub.s32 1, %v3473_v53 }
 0x49e   : > { %1005 = vrot.lane.b32.xlu1 %v3376_v29, %s3812_s25 }
 0x4a2   : > { %1081 = vrot.lane.b32.xlu1 %v3380_v30, %s3812_s25 }
 0x4a7   : > { %929 = vrot.lane.b32.xlu0 %v3372_v28, %s3812_s25 }
 0x4b1   : > { %v835_v15 = vpop.xlane.xlu1 %834 }
 0x4b2   : > { %3102 = vrcp.f32 %v835_v15 }
 0x4bc   : > { %v3103_v16 = vpop.eup %3102 }
 0x4bd   : > { %v846_v17 = vmul.f32 %v3103_v16, %v3095_v59 }
 0x4bf   : > { %2832 = vmatmul.mubr.msk.f32.vlgmr.msra.gmra.mrb[2].mxu0 %vm498_vm2, %v846_v17 }
 0x4c0   : > { %2841 = vmatprep.mubr.msk.f32.mxu0 %vm3203_vm1, %v3204_v13 }
 0x516   : > { %v838_v18 = vpop.xlane.xlu0 %837 }
 0x517   : > { %3104 = vrcp.f32 %v838_v18  ;;  %v1277_v18 = vrot.slane %v3479_v55, %v1276_v14 }
 0x51a   : > { %v841_v19 = vpop.xlane.xlu1 %840 }
 0x51b   : > { %3106 = vrcp.f32 %v841_v19 }
 0x51e   : > { %v1006_v20 = vpop.permute.xlu1 %1005  ;;  %v844_v21 = vpop.xlane.xlu0 %843 }
 0x51f   : > { %3108 = vrcp.f32 %v844_v21  ;;  %2840 = vmatpush3.msra.mxu0 %v1006_v20  ;;  %v1372_v21 = vld [vmem:[%s3809_s8] sm:$0xff] }
 0x520   : > { %2988 = vmatprep.subr.bf16.mxu0 %v3202_v10 }
 0x521   : > { %v3105_v22 = vpop.eup %3104 }
 0x522   : > { %v848_v24 = vmul.f32 %v3105_v22, %v3097_v7  ;;  %v930_v25 = vpop.permute.xlu0 %929  ;;  %v1082_v26 = vpop.permute.xlu1 %1081  ;;  %v1373_v22 = vld [vmem:[%s3809_s8 + $0x8] sm:$0xff] }
 0x523   : > { %2835 = vmatpush3.msra.mxu1 %v930_v25  ;;  %v1374_v25 = vld [vmem:[%s3809_s8 + $0x10] sm:$0xff] }
 0x524   : > { %2837 = vmatmul.mubr.msk.f32.vlgmr.msra.gmra.mrb[8].mxu1 %vm498_vm2, %v848_v24  ;;  %2844 = vmatprep.subr.mxu1 %v3204_v13  ;;  %v3001_v24 = vpack.c.bf16 %v1373_v22, %v1372_v21 }
 0x525   : > { %v3107_v27 = vpop.eup %3106  ;;  %2845 = vmatpush3.msra.mxu1 %v1082_v26  ;;  %2846 = vmatprep.mubr.msk.f32.mxu1 %vm3203_vm1, %v3204_v13  ;;  %v1375_v26 = vld [vmem:[%s3809_s8 + $0x18] sm:$0xff] }
 0x526   : > { %v850_v28 = vmul.f32 %v3107_v27, %v3099_v9  ;;  %2994 = vmatprep.subr.bf16.mxu1 %v3202_v10  ;;  %v3004_v27 = vpack.c.bf16 %v1375_v26, %v1374_v25 }
 0x528   : > { %2842 = vmatmul.mubr.msk.f32.vlgmr.msra.gmra.mrb[4].mxu0 %vm498_vm2, %v850_v28  ;;  %v1376_v28 = vld [vmem:[%s3809_s8 + $0x20] sm:$0xff] }
 0x529   : > { %v3109_v29 = vpop.eup %3108  ;;  %2857 = vmatprep.mubr.msk.f32.mxu0 %vm3203_vm1, %v3204_v13  ;;  %2990 = vmatpush3.bf16.msra.mxu0 %v2989_v36 }
 0x52a   : > { %v852_v30 = vmul.f32 %v3109_v29, %v3101_v12  ;;  %2991 = vmatprep.subr.bf16.mxu0 %v3202_v10  ;;  %v1271_v12 = vsub.s32 0, %v3473_v53  ;;  %v1377_v29 = vld [vmem:[%s3809_s8 + $0x28] sm:$0xff] }
 0x52c   : > { %2847 = vmatmul.mubr.msk.f32.vlgmr.msra.gmra.mrb[10].mxu1 %vm498_vm2, %v852_v30  ;;  %v1272_v15 = vrot.slane %v3479_v55, %v1271_v12  ;;  %v3007_v30 = vpack.c.bf16 %v1377_v29, %v1376_v28 }
 0x52d   : > { %2868 = vmatprep.mubr.msk.f32.mxu1 %vm3203_vm1, %v3204_v13  ;;  %2993 = vmatpush3.bf16.msra.mxu0 %v2992_v39 }
 0x52e   : > { %3000 = vmatprep.subr.bf16.mxu0 %v3202_v10  ;;  %2996 = vmatpush3.bf16.msra.mxu1 %v2995_v5 }
 0x52f   : > { %2997 = vmatprep.subr.bf16.mxu1 %v3202_v10 }
 0x592   : > { %v925_v31 = vpop.f32.mrb[2].mxu0 }
 0x593   : > { %v2833_v32 = vpop.f32.mrb[3].mxu0 }
 0x594   : > { %v1379_v32 = vld [vmem:[%s3809_s8 + $0x38] sm:$0xff] }
 0x5f7   : > { %v1001_v40 = vpop.f32.mrb[8].mxu1 }
 0x5f8   : > { %1158 = vrot.lane.b32.xlu0 %v1001_v40, %s3817_s11  ;;  %v2838_v41 = vpop.f32.mrb[9].mxu1 }
 0x5fb   : > { %v1077_v42 = vpop.f32.mrb[4].mxu0 }
 0x5fc   : > { %1162 = vrot.lane.b32.xlu1 %v1077_v42, %s3818_s12  ;;  %v2843_v43 = vpop.f32.mrb[5].mxu0  ;;  %s359_s12 = sand.u32 1, %s3192_s14  }
 0x5fd   : > { %s2565_s27 = scalar_lea.sflag [#allocation3], %s359_s12 }
 0x5ff   : > { %v1153_v44 = vpop.f32.mrb[10].mxu1 }
 0x600   : > { %1166 = vrot.lane.b32.xlu0 %v1153_v44, %s3816_s18  ;;  %v2848_v45 = vpop.f32.mrb[11].mxu1  ;;  %s2650_s18 = sshll.u32 %s359_s12, 3 }
 0x66a   : > { %v1159_v46 = vpop.permute.xlu0 %1158 }
 0x66b   : > { %v1169_v48 = vsel %vm498_vm2, %v925_v31, %v1159_v46  ;;  %v1378_v31 = vld [vmem:[%s3809_s8 + $0x30] sm:$0xff] }
 0x66c   : > { %v3010_v33 = vpack.c.bf16 %v1379_v32, %v1378_v31 }
 0x66e   : > { %v1163_v47 = vpop.permute.xlu1 %1162 }
 0x66f   : > { %v1171_v49 = vsel %vm1170_vm3, %v1169_v48, %v1163_v47  ;;  %v1382_v48 = vsub.s32 5, %v3473_v53 }
 0x672   : > { %v1167_v50 = vpop.permute.xlu0 %1166 }
 0x673   : > { %v1173_v51 = vsel %vm1172_vm4, %v1171_v49, %v1167_v50  ;;  %v1383_v49 = vrot.slane %v3479_v55, %v1382_v48 }
 0x674   : > { %2858 = vmatmul.mubr.msk.f32.vlgmr.msra.gmra.mrb[6].mxu0 %vm372_vm0, %v1173_v51 }
 0x675   : > { %2887 = vmatprep.mubr.msk.f32.mxu0 %vm3203_vm1, %v3204_v13  ;;  %3002 = vmatpush3.bf16.msra.mxu0 %v3001_v24 }
 0x676   : > { %3003 = vmatprep.subr.bf16.mxu0 %v3202_v10 }
 0x679   : > { %3005 = vmatpush3.bf16.msra.mxu0 %v3004_v27 }
 0x67a   : > { %3006 = vmatprep.subr.bf16.mxu0 %v3202_v10 }
 0x67d   : > { %3008 = vmatpush3.bf16.msra.mxu0 %v3007_v30 }
 0x67e   : > { %3009 = vmatprep.subr.bf16.mxu0 %v3202_v10 }
 0x681   : > { %3011 = vmatpush3.bf16.msra.mxu0 %v3010_v33 }
 0x682   : > { %2911 = vmatprep.subr.mxu0 %v3204_v13 }
 0x747   : > { %v1251_v57 = vpop.f32.mrb[6].mxu0 }
 0x748   : > { %v1252_v58 = vadd.f32 %v1251_v57, %v1181_v56  ;;  %v2859_v59 = vpop.f32.mrb[7].mxu0 }
 0x74a   : > { %v1255_v60 = vadd.f32 %v1252_v58, %v3353_v23  ;;  %v1281_v23 = vld [vmem:[%s3807_s6 + $0x10] sm:$0xff] }
 0x74b   : > { %v2998_v7 = vpack.c.bf16 %v1282_v6, %v1281_v23 }
 0x74c   : > { %v1256_v61 = vsel %vm372_vm0, %v1255_v60, 0.0 }
 0x74d   : > { %1257 = vadd.xlane.f32.xlu1 %v1256_v61  ;;  %2999 = vmatpush3.bf16.msra.mxu1 %v2998_v7  ;;  %v1474_v7 = vsub.s32 2, %v3473_v53 }
 0x74e   : > { %3012 = vmatprep.subr.bf16.mxu1 %v3202_v10 }
 0x7da   : > { %v1258_v62 = vpop.xlane.xlu1 %1257 }
 0x7db   : > { %v1259_v63 = vmul.f32 0.03125, %v1258_v62 }
 0x7dd   : > { %v1260_v0 = vsub.f32 %v1255_v60, %v1259_v63  ;;  %v2674_v63 = vld [vmem:[%s3804_s3 + $0x20] sm:$0xff] }
 0x7df   : > { %v1261_v1 = vmul.f32 %v1260_v0, %v1260_v0 }
 0x7e1   : > { %v1262_v2 = vsel %vm372_vm0, %v1261_v1, 0.0 }
 0x7e2   : > { %1263 = vadd.xlane.f32.xlu0 %v1262_v2  ;;  %v2676_v2 = vld [vmem:[%s3804_s3 + $0x30] sm:$0xff] }
 0x7e3   : > { %v3016_v4 = vpack.c.bf16 %v2677_v3, %v2676_v2 }
 0x86f   : > { %v1264_v8 = vpop.xlane.xlu0 %1263 }
 0x870   : > { %v1265_v9 = vmul.f32 0.03125, %v1264_v8  ;;  %v1479_v8 = vsub.s32 3, %v3473_v53 }
 0x872   : > { %v1266_v11 = vadd.f32 1e-12, %v1265_v9  ;;  %v1475_v9 = vrot.slane %v3479_v55, %v1474_v7 }
 0x874   : > { %3110 = vrsqrt.f32 %v1266_v11 }
 0x87e   : > { %v3111_v16 = vpop.eup %3110 }
 0x87f   : > { %v1268_v17 = vmul.f32 %v3111_v16, %v1260_v0  ;;  %v2675_v0 = vld [vmem:[%s3804_s3 + $0x28] sm:$0xff]  ;;  %v1480_v16 = vrot.slane %v3479_v55, %v1479_v8 }
 0x880   : > { %v3013_v1 = vpack.c.bf16 %v2675_v0, %v2674_v63 }
 0x881   : > { %v1273_v19 = vmul.f32 %v1272_v15, %v1268_v17 }
 0x883   : > { %v1278_v20 = vadd.f32 %v1277_v18, %v1273_v19  ;;  %v2679_v19 = vld [vmem:[%s3805_s4 + $0x1] ss:$0 sm:$0xff] }
 0x885   : > { %2869 = vmatmul.mubr.msk.f32.vlgmr.msra.gmra.mrb[12].mxu1 %vm372_vm0, %v1278_v20 }
 0x886   : > { %2898 = vmatprep.mubr.msk.f32.mxu1 %vm3203_vm1, %v3204_v13  ;;  %3014 = vmatpush3.bf16.msra.mxu1 %v3013_v1 }
 0x887   : > { %3015 = vmatprep.subr.bf16.mxu1 %v3202_v10 }
 0x88a   : > { %3017 = vmatpush3.bf16.msra.mxu1 %v3016_v4 }
 0x88b   : > { %2901 = vmatprep.subr.mxu1 %v3204_v13 }
 0x958   : > { %v1359_v36 = vpop.f32.mrb[12].mxu1 }
 0x959   : > { %v1360_v37 = vadd.f32 %v2670_v34, %v1359_v36  ;;  %v2870_v38 = vpop.f32.mrb[13].mxu1 }
 0x95b   : > { %v1363_v39 = vmul.f32 %v1360_v37, %v1360_v37 }
 0x95d   : > { %v1364_v40 = vmul.f32 %v1363_v39, %v1360_v37 }
 0x95f   : > { %v1365_v41 = vmul.f32 0.044715, %v1364_v40 }
 0x961   : > { %v1366_v42 = vadd.f32 %v1365_v41, %v1360_v37 }
 0x963   : > { %v1367_v43 = vmul.f32 0.7978846, %v1366_v42 }
 0x965   : > { %3112 = vtanh.f32 %v1367_v43 }
 0x96f   : > { %v3113_v44 = vpop.eup %3112 }
 0x970   : > { %v1369_v45 = vadd.f32 1.0, %v3113_v44 }
 0x972   : > { %v1370_v46 = vmul.f32 0.5, %v1369_v45 }
 0x974   : > { %v1371_v47 = vmul.f32 %v1370_v46, %v1360_v37 }
 0x976   : > { %2888 = vmatmul.mubr.msk.f32.vlgmr.msra.gmra.mrb[8].mxu0 %vm1384_vm5, %v1371_v47 }
 0x977   : > { %2913 = vmatprep.mubr.msk.f32.mxu0 %vm3203_vm1, %v3204_v13 }
 0xa49   : > { %v1454_v50 = vpop.f32.mrb[8].mxu0 }
 0xa4a   : > { %v1455_v51 = vadd.f32 %v1454_v50, %v1383_v49  ;;  %v2889_v52 = vpop.f32.mrb[9].mxu0 }
 0xa4c   : > { %v1458_v56 = vadd.f32 %v1455_v51, %v1278_v20 }
 0xa4e   : > { %v1459_v57 = vsel %vm372_vm0, %v1458_v56, 0.0 }
 0xa4f   : > { %1460 = vadd.xlane.f32.xlu0 %v1459_v57 }
 0xadc   : > { %v1461_v58 = vpop.xlane.xlu0 %1460 }
 0xadd   : > { %v1462_v59 = vmul.f32 0.03125, %v1461_v58 }
 0xadf   : > { %v1463_v60 = vsub.f32 %v1458_v56, %v1462_v59 }
 0xae1   : > { %v1464_v61 = vmul.f32 %v1463_v60, %v1463_v60 }
 0xae3   : > { %v1465_v62 = vsel %vm372_vm0, %v1464_v61, 0.0 }
 0xae4   : > { %1466 = vadd.xlane.f32.xlu1 %v1465_v62 }
 0xb71   : > { %v1467_v5 = vpop.xlane.xlu1 %1466 }
 0xb72   : > { %v1468_v23 = vmul.f32 0.03125, %v1467_v5 }
 0xb74   : > { %v1469_v6 = vadd.f32 1e-12, %v1468_v23 }
 0xb76   : > { %3114 = vrsqrt.f32 %v1469_v6 }
 0xb80   : > { %v3115_v11 = vpop.eup %3114 }
 0xb81   : > { %v1471_v15 = vmul.f32 %v3115_v11, %v1463_v60 }
 0xb83   : > { %v1476_v17 = vmul.f32 %v1475_v9, %v1471_v15 }
 0xb85   : > { %v3574_v18 = vadd.f32 %v1480_v16, %v1476_v17 }
 0xb87   : > { %2899 = vmatmul.mubr.msk.f32.vlgmr.msra.gmra.mrb[14].mxu1 %vm372_vm0, %v3574_v18 }
 0xb88   : > { %2903 = vmatprep.mubr.msk.f32.mxu1 %vm3203_vm1, %v3204_v13 }
 0xc5a   : > { %v1566_v20 = vpop.f32.mrb[14].mxu1 }
 0xc5b   : > { %v1567_v21 = vadd.f32 %v2679_v19, %v1566_v20  ;;  %v2900_v22 = vpop.f32.mrb[15].mxu1 }
 0xc5d   : > { %1573 = vrot.lane.b32.xlu1 %v1567_v21, %s3207_s26  ;;  %1571 = vrot.lane.b32.xlu0 %v1567_v21, %s3206_s21 }
 0xc61   : > { %1575 = vrot.lane.b32.xlu1 %v1567_v21, %s3205_s20  ;;  %1577 = vrot.lane.b32.xlu0 %v1567_v21, %s3821_s29  ;;  %s3822_s20 = smov 64  }
 0xccf   : > { %v3587_v55 = vpop.permute.xlu1 %1573  ;;  %v3589_v24 = vpop.permute.xlu0 %1571 }
 0xcd0   : > { %1729 = vrot.lane.b32.xlu0 %v3587_v55, %s3821_s29  ;;  %1653 = vrot.lane.b32.xlu1 %v3589_v24, %s3821_s29 }
 0xcd3   : > { %v3595_v25 = vpop.permute.xlu1 %1575  ;;  %v1578_v26 = vpop.permute.xlu0 %1577 }
 0xcd4   : > { %1805 = vrot.lane.b32.xlu1 %v3595_v25, %s3821_s29  ;;  %2902 = vmatpush3.xpose.msk.msra.mxu1 %vm498_vm2, %v1578_v26  ;;  %s3824_s29 = smov 8  }
 0xcd5   : > { %2906 = vmatprep.subr.mxu1 %v3204_v13 }
 0xcd7   : > { %2904 = vmatmul.mubr.msk.f32.vlgmr.msra.gmra.mrb[16].mxu1 %vm498_vm2, %v1567_v21 }
 0xcd8   : > { %2908 = vmatprep.mubr.msk.f32.mxu1 %vm3203_vm1, %v3204_v13 }
 0xd42   : > { %v1654_v27 = vpop.permute.xlu1 %1653  ;;  %v1730_v28 = vpop.permute.xlu0 %1729 }
 0xd43   : > { %2907 = vmatpush3.xpose.msk.msra.mxu1 %vm498_vm2, %v1654_v27  ;;  %2912 = vmatpush3.xpose.msk.msra.mxu0 %vm498_vm2, %v1730_v28 }
 0xd44   : > { %2916 = vmatprep.subr.mxu1 %v3204_v13  ;;  %2921 = vmatprep.subr.mxu0 %v3204_v13 }
 0xd46   : > { %v1806_v29 = vpop.permute.xlu1 %1805  ;;  %2909 = vmatmul.mubr.msk.f32.vlgmr.msra.gmra.mrb[18].mxu1 %vm498_vm2, %v3589_v24  ;;  %2914 = vmatmul.mubr.msk.f32.vlgmr.msra.gmra.mrb[10].mxu0 %vm498_vm2, %v3587_v55 }
 0xd47   : > { %2917 = vmatpush3.xpose.msk.msra.mxu1 %vm498_vm2, %v1806_v29  ;;  %2918 = vmatprep.mubr.msk.f32.mxu1 %vm3203_vm1, %v3204_v13 }
 0xd48   : > { %2923 = vmatprep.mubr.msk.f32.mxu0 %vm3203_vm1, %v3204_v13  ;;  %2926 = vmatprep.subr.mxu1 %v3204_v13 }
 0xd4a   : > { %2919 = vmatmul.mubr.msk.f32.vlgmr.msra.gmra.mrb[20].mxu1 %vm498_vm2, %v3595_v25 }
 0xd4b   : > { %2928 = vmatprep.mubr.msk.f32.mxu1 %vm3203_vm1, %v3204_v13 }
 0xdaa   : > { %v1649_v30 = vpop.f32.mrb[16].mxu1 }
 0xdab   : > { %v1881_v31 = vmul.f32 0.35355338, %v1649_v30  ;;  %v2905_v32 = vpop.f32.mrb[17].mxu1 }
 0xdac   : > { %v2693_v32 = vld [vmem:[%s3806_s5 + $0x20] sm:$0xff] }
 0xdad   : > { %v1885_v33 = vadd.f32 %v3412_v35, %v1881_v31 }
 0xdaf   : > { %v1889_v34 = vsel %vm498_vm2, %v1885_v33, -inf }
 0xdb0   : > { %1890 = vmax.xlane.f32.xlu0 %v1889_v34 }
 0xe19   : > { %v1725_v36 = vpop.f32.mrb[18].mxu1  ;;  %v1801_v37 = vpop.f32.mrb[10].mxu0 }
 0xe1a   : > { %v1882_v38 = vmul.f32 0.35355338, %v1725_v36  ;;  %v1883_v39 = vmul.f32 0.35355338, %v1801_v37  ;;  %v2910_v40 = vpop.f32.mrb[19].mxu1  ;;  %v2915_v41 = vpop.f32.mrb[11].mxu0 }
 0xe1c   : > { %v1887_v42 = vadd.f32 %v3412_v35, %v1883_v39  ;;  %v1886_v43 = vadd.f32 %v3412_v35, %v1882_v38  ;;  %v2695_v38 = vld [vmem:[%s3806_s5 + $0x30] sm:$0xff]  ;;  %v2696_v39 = vld [vmem:[%s3806_s5 + $0x38] sm:$0xff] }
 0xe1d   : > { %v1877_v44 = vpop.f32.mrb[20].mxu1  ;;  %v3022_v40 = vpack.c.bf16 %v2696_v39, %v2695_v38 }
 0xe1e   : > { %v1884_v45 = vmul.f32 0.35355338, %v1877_v44  ;;  %v2920_v46 = vpop.f32.mrb[21].mxu1  ;;  %v1895_v47 = vsel %vm498_vm2, %v1887_v42, -inf  ;;  %v1892_v49 = vsel %vm498_vm2, %v1886_v43, -inf }
 0xe1f   : > { %1896 = vmax.xlane.f32.xlu0 %v1895_v47  ;;  %1893 = vmax.xlane.f32.xlu1 %v1892_v49 }
 0xe20   : > { %v1888_v50 = vadd.f32 %v3412_v35, %v1884_v45 }
 0xe22   : > { %v1898_v51 = vsel %vm498_vm2, %v1888_v50, -inf }
 0xe23   : > { %1899 = vmax.xlane.f32.xlu0 %v1898_v51 }
 0xe30   : > { %1933 = vrot.lane.b32.xlu1 %v1567_v21, %s3822_s20 }
 0xe3d   : > { %v1891_v52 = vpop.xlane.xlu0 %1890 }
 0xe3e   : > { %v1901_v56 = vsub.f32 %v1885_v33, %v1891_v52  ;;  %v2694_v33 = vld [vmem:[%s3806_s5 + $0x28] sm:$0xff] }
 0xe3f   : > { %v3019_v34 = vpack.c.bf16 %v2694_v33, %v2693_v32  ;;  %v2703_v32 = vld [vmem:[%s3808_s7 + $0x1] ss:$0 sm:$0xff] }
 0xe40   : > { %v1905_v57 = vmul.f32 1.442695, %v1901_v56 }
 0xe42   : > { %3116 = vpow2.f32 %v1905_v57  ;;  %v3683_v57 = vld [vmem:[%s3810_s9 + $0x8] sm:$0x3f] }
 0xe4c   : > { %v3117_v58 = vpop.eup %3116 }
 0xe4d   : > { %v1913_v59 = vsel %vm498_vm2, %v3117_v58, 0.0 }
 0xe54   : > { %1914 = vadd.xlane.f32.xlu1 %v1913_v59 }
 0xeac   : > { %v1897_v60 = vpop.xlane.xlu0 %1896  ;;  %v1894_v61 = vpop.xlane.xlu1 %1893 }
 0xead   : > { %v1903_v62 = vsub.f32 %v1887_v42, %v1897_v60  ;;  %v1902_v63 = vsub.f32 %v1886_v43, %v1894_v61 }
 0xeaf   : > { %v1909_v0 = vmul.f32 1.442695, %v1903_v62  ;;  %v1907_v1 = vmul.f32 1.442695, %v1902_v63 }
 0xeb0   : > { %v1934_v35 = vpop.permute.xlu1 %1933  ;;  %v1900_v2 = vpop.xlane.xlu0 %1899 }
 0xeb1   : > { %3118 = vpow2.f32 %v1909_v0  ;;  %v1904_v3 = vsub.f32 %v1888_v50, %v1900_v2  ;;  %2922 = vmatpush3.msra.mxu0 %v1934_v35 }
 0xeb2   : > { %3120 = vpow2.f32 %v1907_v1  ;;  %2931 = vmatprep.subr.mxu0 %v3204_v13 }
 0xeb3   : > { %v1911_v4 = vmul.f32 1.442695, %v1904_v3  ;;  %v2698_v3 = vld [vmem:[%s3807_s6 + $0x20] sm:$0xff] }
 0xeb5   : > { %3122 = vpow2.f32 %v1911_v4 }
 0xebb   : > { %v3119_v5 = vpop.eup %3118 }
 0xebc   : > { %v3121_v23 = vpop.eup %3120  ;;  %v1919_v6 = vsel %vm498_vm2, %v3119_v5, 0.0 }
 0xebd   : > { %1920 = vadd.xlane.f32.xlu1 %v1919_v6  ;;  %v1916_v9 = vsel %vm498_vm2, %v3121_v23, 0.0 }
 0xebe   : > { %1917 = vadd.xlane.f32.xlu0 %v1916_v9 }
 0xebf   : > { %v3123_v11 = vpop.eup %3122 }
 0xec0   : > { %v1922_v15 = vsel %vm498_vm2, %v3123_v11, 0.0 }
 0xec2   : > { %1923 = vadd.xlane.f32.xlu0 %v1922_v15  ;;  %v2351_v15 = vrot.slane %v3683_v57, %v1271_v12  ;;  %v2707_v12 = vld [vmem:[%s3809_s8 + $0x50] sm:$0xff] }
 0xece   : > { %2085 = vrot.lane.b32.xlu1 %v3587_v55, %s3822_s20 }
 0xed2   : > { %2161 = vrot.lane.b32.xlu1 %v3595_v25, %s3822_s20 }
 0xed8   : > { %2009 = vrot.lane.b32.xlu0 %v3589_v24, %s3822_s20  ;;  %s3825_s20 = smov 24  }
 0xee1   : > { %v1915_v16 = vpop.xlane.xlu1 %1914 }
 0xee2   : > { %3124 = vrcp.f32 %v1915_v16 }
 0xeec   : > { %v3125_v17 = vpop.eup %3124 }
 0xeed   : > { %v1926_v19 = vmul.f32 %v3125_v17, %v3117_v58  ;;  %v2260_v58 = vrot.slane %v3683_v57, %v1180_v54  ;;  %v2699_v54 = vld [vmem:[%s3807_s6 + $0x28] sm:$0xff] }
 0xeee   : > { %v3025_v4 = vpack.c.bf16 %v2699_v54, %v2698_v3 }
 0xeef   : > { %2924 = vmatmul.mubr.msk.f32.vlgmr.msra.gmra.mrb[12].mxu0 %vm498_vm2, %v1926_v19  ;;  %v2356_v19 = vrot.slane %v3683_v57, %v1276_v14  ;;  %v2708_v14 = vld [vmem:[%s3809_s8 + $0x58] sm:$0xff] }
 0xef0   : > { %2933 = vmatprep.mubr.msk.f32.mxu0 %vm3203_vm1, %v3204_v13 }
 0xf4a   : > { %v1921_v20 = vpop.xlane.xlu1 %1920 }
 0xf4b   : > { %3126 = vrcp.f32 %v1921_v20  ;;  %v1918_v21 = vpop.xlane.xlu0 %1917 }
 0xf4c   : > { %3128 = vrcp.f32 %v1918_v21 }
 0xf4e   : > { %v2086_v22 = vpop.permute.xlu1 %2085 }
 0xf4f   : > { %v1924_v55 = vpop.xlane.xlu0 %1923  ;;  %2932 = vmatpush3.msra.mxu0 %v2086_v22  ;;  %v2705_v22 = vld [vmem:[%s3809_s8 + $0x40] sm:$0xff] }
 0xf50   : > { %3130 = vrcp.f32 %v1924_v55  ;;  %3018 = vmatprep.subr.bf16.mxu0 %v3202_v10  ;;  %v2706_v55 = vld [vmem:[%s3809_s8 + $0x48] sm:$0xff] }
 0xf52   : > { %v2162_v29 = vpop.permute.xlu1 %2161 }
 0xf53   : > { %v2010_v24 = vpop.permute.xlu0 %2009 }
 0xf54   : > { %2927 = vmatpush3.msra.mxu1 %v2010_v24  ;;  %v3031_v24 = vpack.c.bf16 %v2706_v55, %v2705_v22 }
 0xf55   : > { %v3127_v25 = vpop.eup %3126  ;;  %2936 = vmatprep.subr.mxu1 %v3204_v13 }
 0xf56   : > { %v3129_v26 = vpop.eup %3128  ;;  %v1930_v27 = vmul.f32 %v3127_v25, %v3119_v5  ;;  %v2701_v5 = vld [vmem:[%s3807_s6 + $0x38] sm:$0xff]  ;;  %v3034_v25 = vpack.c.bf16 %v2708_v14, %v2707_v12 }
 0xf57   : > { %v1928_v28 = vmul.f32 %v3129_v26, %v3121_v23  ;;  %v2709_v26 = vld [vmem:[%s3809_s8 + $0x60] sm:$0xff] }
 0xf58   : > { %2934 = vmatmul.mubr.msk.f32.vlgmr.msra.gmra.mrb[14].mxu0 %vm498_vm2, %v1930_v27  ;;  %v2710_v27 = vld [vmem:[%s3809_s8 + $0x68] sm:$0xff] }
 0xf59   : > { %2929 = vmatmul.mubr.msk.f32.vlgmr.msra.gmra.mrb[22].mxu1 %vm498_vm2, %v1928_v28  ;;  %2949 = vmatprep.mubr.msk.f32.mxu0 %vm3203_vm1, %v3204_v13  ;;  %v3037_v28 = vpack.c.bf16 %v2710_v27, %v2709_v26 }
 0xf5a   : > { %v3131_v30 = vpop.eup %3130  ;;  %2937 = vmatpush3.msra.mxu1 %v2162_v29  ;;  %2938 = vmatprep.mubr.msk.f32.mxu1 %vm3203_vm1, %v3204_v13  ;;  %v2711_v29 = vld [vmem:[%s3809_s8 + $0x70] sm:$0xff] }
 0xf5b   : > { %v1932_v31 = vmul.f32 %v3131_v30, %v3123_v11  ;;  %3024 = vmatprep.subr.bf16.mxu1 %v3202_v10  ;;  %3020 = vmatpush3.bf16.msra.mxu0 %v3019_v34  ;;  %v2712_v30 = vld [vmem:[%s3809_s8 + $0x78] sm:$0xff] }
 0xf5c   : > { %3021 = vmatprep.subr.bf16.mxu0 %v3202_v10 }
 0xf5d   : > { %2939 = vmatmul.mubr.msk.f32.vlgmr.msra.gmra.mrb[24].mxu1 %vm498_vm2, %v1932_v31  ;;  %v3040_v31 = vpack.c.bf16 %v2712_v30, %v2711_v29 }
 0xf5e   : > { %2960 = vmatprep.mubr.msk.f32.mxu1 %vm3203_vm1, %v3204_v13  ;;  %3026 = vmatpush3.bf16.msra.mxu1 %v3025_v4 }
 0xf5f   : > { %3023 = vmatpush3.bf16.msra.mxu0 %v3022_v40  ;;  %3027 = vmatprep.subr.bf16.mxu1 %v3202_v10 }
 0xf60   : > { %3030 = vmatprep.subr.bf16.mxu0 %v3202_v10 }
 0xfc2   : > { %v2005_v36 = vpop.f32.mrb[12].mxu0 }
 0xfc3   : > { %v2925_v37 = vpop.f32.mrb[13].mxu0 }
0x102b   : > { %v2157_v41 = vpop.f32.mrb[14].mxu0 }
0x102c   : > { %v2081_v42 = vpop.f32.mrb[22].mxu1  ;;  %2242 = vrot.lane.b32.xlu1 %v2157_v41, %s3823_s28  ;;  %v2935_v43 = vpop.f32.mrb[15].mxu0  ;;  %s2715_s28 = sshll.u32 %s3290_s17, 7  ;;  %s3213_s17 = smov [#allocation2]  }
0x102d   : > { %2238 = vrot.lane.b32.xlu0 %v2081_v42, %s3824_s29  ;;  %v2930_v44 = vpop.f32.mrb[23].mxu1  ;;  %s361_s29 = scalar_lea.vmem [#allocation2], %s2650_s18  ;;  %s3758_s30 = scalar_lea.hbm %s3811_s10, %s2715_s28 }
0x102e   : > { %s3142_s11 = sshll.u32 %s3213_s17, 4  ;;  %s3143_s11 = int_to_ptr.vmem [resolvable:$false] %s3142_s11 }
0x102f   : > { %s3144_s18 = scalar_lea.vmem %s3143_s11, 256 }
0x1030   : > { %v2233_v45 = vpop.f32.mrb[24].mxu1 }
0x1031   : > { %2246 = vrot.lane.b32.xlu0 %v2233_v45, %s3825_s20  ;;  %v2940_v46 = vpop.f32.mrb[25].mxu1  ;;  %v2465_v45 = vrot.slane %v3683_v57, %v1382_v48  ;;  %v2556_v48 = vrot.slane %v3683_v57, %v1474_v7  ;;  %s2578_s20 = sshll.u32 %s361_s29, 4  ;;  %s3760_s20 = int_to_ptr.vmem [resolvable:$true] %s2578_s20 }
0x1032   : > { %s3138_s25 = scalar_lea.vmem %s3760_s20, 128  ;;  %p3145_p0 = scmp.lt.s32.totalorder %s3760_s20, %s3143_s11 }
0x1033   : > { %p3139_p11 = scmp.ne.s32.totalorder %s3760_s20, %s3138_s25  ;;  %p3146_p1 = scmp.lt.s32.totalorder %s3144_s18, %s3138_s25 }
0x1035   : > { %p3140_p12 = pnand %p3139_p11, %p3307_p5  ;;  %p3147_p2 = por %p3146_p1, %p3145_p0 }
0x1037   : > { %p3141_p13 = pneg %p3140_p12 }
0x1039   : > { %p3148_p3 = pnand %p3147_p2, %p3141_p13 }
0x109e   : > { %v2243_v49 = vpop.permute.xlu1 %2242 }
0x109f   : > { %v2239_v47 = vpop.permute.xlu0 %2238 }
0x10a0   : > { %v2249_v50 = vsel %vm498_vm2, %v2005_v36, %v2239_v47 }
0x10a1   : > { %v2250_v51 = vsel %vm1170_vm3, %v2249_v50, %v2243_v49 }
0x10a3   : > { %v2247_v52 = vpop.permute.xlu0 %2246 }
0x10a4   : > { %v2251_v56 = vsel %vm1172_vm4, %v2250_v51, %v2247_v52 }
0x10a5   : > { %2950 = vmatmul.mubr.msk.f32.vlgmr.msra.gmra.mrb[16].mxu0 %vm372_vm0, %v2251_v56 }
0x10a6   : > { %2979 = vmatprep.mubr.msk.f32.mxu0 %vm3203_vm1, %v3204_v13  ;;  %3032 = vmatpush3.bf16.msra.mxu0 %v3031_v24 }
0x10a7   : > { %3033 = vmatprep.subr.bf16.mxu0 %v3202_v10 }
0x10aa   : > { %3035 = vmatpush3.bf16.msra.mxu0 %v3034_v25 }
0x10ab   : > { %3036 = vmatprep.subr.bf16.mxu0 %v3202_v10 }
0x10ae   : > { %3038 = vmatpush3.bf16.msra.mxu0 %v3037_v28 }
0x10af   : > { %3039 = vmatprep.subr.bf16.mxu0 %v3202_v10 }
0x10b2   : > { %3041 = vmatpush3.bf16.msra.mxu0 %v3040_v31 }
0x1178   : > { %v2330_v59 = vpop.f32.mrb[16].mxu0 }
0x1179   : > { %v2331_v60 = vadd.f32 %v2330_v59, %v2260_v58  ;;  %v2951_v61 = vpop.f32.mrb[17].mxu0 }
0x117b   : > { %v2334_v62 = vadd.f32 %v2331_v60, %v3574_v18  ;;  %v2700_v18 = vld [vmem:[%s3807_s6 + $0x30] sm:$0xff] }
0x117c   : > { %v3028_v23 = vpack.c.bf16 %v2701_v5, %v2700_v18 }
0x117d   : > { %v2335_v63 = vsel %vm372_vm0, %v2334_v62, 0.0 }
0x117e   : > { %2336 = vadd.xlane.f32.xlu1 %v2335_v63  ;;  %3029 = vmatpush3.bf16.msra.mxu1 %v3028_v23 }
0x120b   : > { %v2337_v0 = vpop.xlane.xlu1 %2336 }
0x120c   : > { %v2338_v1 = vmul.f32 0.03125, %v2337_v0 }
0x120e   : > { %v2339_v13 = vsub.f32 %v2334_v62, %v2338_v1 }
0x1210   : > { %v2340_v35 = vmul.f32 %v2339_v13, %v2339_v13 }
0x1212   : > { %v2341_v2 = vsel %vm372_vm0, %v2340_v35, 0.0 }
0x1213   : > { %2342 = vadd.xlane.f32.xlu0 %v2341_v2 }
0x12a0   : > { %v2343_v6 = vpop.xlane.xlu0 %2342 }
0x12a1   : > { %v2344_v9 = vmul.f32 0.03125, %v2343_v6 }
0x12a3   : > { %v2345_v11 = vadd.f32 1e-12, %v2344_v9 }
0x12a5   : > { %3132 = vrsqrt.f32 %v2345_v11 }
0x12af   : > { %v3133_v16 = vpop.eup %3132 }
0x12b0   : > { %v2347_v17 = vmul.f32 %v3133_v16, %v2339_v13  ;;  %v2561_v13 = vrot.slane %v3683_v57, %v1479_v8 }
0x12b2   : > { %v2352_v20 = vmul.f32 %v2351_v15, %v2347_v17 }
0x12b4   : > { %v2357_v21 = vadd.f32 %v2356_v19, %v2352_v20 }
0x12b6   : > { %2961 = vmatmul.mubr.msk.f32.vlgmr.msra.gmra.mrb[26].mxu1 %vm372_vm0, %v2357_v21 }
0x1389   : > { %v2440_v33 = vpop.f32.mrb[26].mxu1 }
0x138a   : > { %v2441_v34 = vadd.f32 %v2703_v32, %v2440_v33  ;;  %v2962_v36 = vpop.f32.mrb[27].mxu1 }
0x138c   : > { %v2444_v37 = vmul.f32 %v2441_v34, %v2441_v34 }
0x138e   : > { %v2445_v38 = vmul.f32 %v2444_v37, %v2441_v34 }
0x1390   : > { %v2446_v10 = vmul.f32 0.044715, %v2445_v38 }
0x1392   : > { %v2447_v39 = vadd.f32 %v2446_v10, %v2441_v34 }
0x1394   : > { %v2448_v40 = vmul.f32 0.7978846, %v2447_v39 }
0x1396   : > { %3134 = vtanh.f32 %v2448_v40 }
0x13a0   : > { %v3135_v41 = vpop.eup %3134 }
0x13a1   : > { %v2450_v42 = vadd.f32 1.0, %v3135_v41 }
0x13a3   : > { %v2451_v43 = vmul.f32 0.5, %v2450_v42 }
0x13a5   : > { %v2452_v44 = vmul.f32 %v2451_v43, %v2441_v34 }
0x13a7   : > { %2980 = vmatmul.mubr.msk.f32.vlgmr.msra.gmra.mrb[18].mxu0 %vm1384_vm5, %v2452_v44 }
0x147a   : > { %v2535_v46 = vpop.f32.mrb[18].mxu0 }
0x147b   : > { %v2536_v47 = vadd.f32 %v2535_v46, %v2465_v45  ;;  %v2981_v49 = vpop.f32.mrb[19].mxu0 }
0x147d   : > { %v2539_v50 = vadd.f32 %v2536_v47, %v2357_v21 }
0x147f   : > { %v2540_v51 = vsel %vm372_vm0, %v2539_v50, 0.0 }
0x1480   : > { %2541 = vadd.xlane.f32.xlu0 %v2540_v51 }
0x150d   : > { %v2542_v52 = vpop.xlane.xlu0 %2541 }
0x150e   : > { %v2543_v56 = vmul.f32 0.03125, %v2542_v52 }
0x1510   : > { %v2544_v58 = vsub.f32 %v2539_v50, %v2543_v56 }
0x1512   : > { %v2545_v59 = vmul.f32 %v2544_v58, %v2544_v58 }
0x1514   : > { %v2546_v60 = vsel %vm372_vm0, %v2545_v59, 0.0 }
0x1515   : > { %2547 = vadd.xlane.f32.xlu1 %v2546_v60 }
0x15a2   : > { %v2548_v61 = vpop.xlane.xlu1 %2547 }
0x15a3   : > { %v2549_v62 = vmul.f32 0.03125, %v2548_v61 }
0x15a5   : > { %v2550_v63 = vadd.f32 1e-12, %v2549_v62 }
0x15a7   : > { %3136 = vrsqrt.f32 %v2550_v63 }
0x15b1   : > { %v3137_v0 = vpop.eup %3136 }
0x15b2   : > { %v2552_v1 = vmul.f32 %v3137_v0, %v2544_v58 }
0x15b4   : > { %v2557_v35 = vmul.f32 %v2556_v48, %v2552_v1 }
0x15b6   : > { %v2562_v2 = vadd.f32 %v2561_v13, %v2557_v35 }
0x15b8   : > { %2563 = vst.msk [vmem:[%s361_s29] sm:$0xff] %vm372_vm0, %v2562_v2 }
0x15b9   : > { %3151 = shalt.err (!%p3148_p3)
}
0x15ba   : > { %s3152_s12 = scalar_lea.hbm %s3758_s30, 128  ;;  %s3156_s21 = scalar_lea.hbm %s3811_s10, 256 }
0x15bb   : > { %p3153_p4 = scmp.ne.s32.totalorder %s3758_s30, %s3152_s12  ;;  %p3157_p9 = scmp.lt.u32.totalorder %s3758_s30, %s3811_s10 }
0x15bc   : > { %p3158_p10 = scmp.lt.u32.totalorder %s3156_s21, %s3152_s12  ;;  %p3160_p12 = scmp.lt.u32.totalorder %s3152_s12, %s3758_s30 }
0x15bd   : > { %p3154_p7 = pnand %p3153_p4, %p3307_p5 }
0x15be   : > { %p3159_p11 = por %p3158_p10, %p3157_p9 }
0x15bf   : > { %p3155_p8 = pneg %p3154_p7 }
0x15c0   : > { %p3161_p13 = por %p3160_p12, %p3159_p11 }
0x15c2   : > { %p3162_p0 = pnand %p3161_p13, %p3155_p8 }
0x15c4   : > { %3165 = shalt.err (!%p3162_p0)
}
0x15c5   : > { %3042 = dma.vmem_to_hbm [thread:$0]  (%p3307_p5), %s3760_s20, 128, %s3758_s30, %s2565_s27  }
0x15c6 PF: > { %p3048_p1 = scmp.ge.s32.totalorder %s3200_s16, 2  ;;  %s2590_s25 = sand.u32 1, %s3188_s13  }
0x15c7   : > { %s2591_s11 = scalar_lea.sflag [#allocation3], %s2590_s25 }
0x15c8   : > { %p3045_p2 = pnand %p3048_p1, %p3311_p6 }
0x15ca   : > { %3183 = dma.done.wait (!%p3045_p2), %s2591_s11, 128  }
0x15cb   : > { %3185 = vsyncadd (!%p3045_p2), %s2591_s11, 4294967168  ;;  %p20_p3 = scmp.ge.s32.totalorder %s3294_s19, 4   ;;  %s3826_s13 = smov %s3192_s14 }
0x15cc   : > { %s3827_s14 = smov %s3196_s15  ;;  %s3828_s15 = smov %s3305_s22 }
0x15cd   : > { %s3829_s16 = smov %s3294_s19  ;;  %22 = sbr.rel (!%p20_p3) target bundleno = 3 (0x3), region = 105 }
0x15d4   :  { %2596 = vsyncpa [#allocation3], 1 }
0x15d5   :  { %2598 = vsyncpa [#allocation3 + $0x1], 1 }

</bundles_post_ra>
